<compile_context>
chip_gen: v6e
topology: v6e:2x2x1
jax: 0.10.0
libtpu: 0.0.40
codegen_flags: <defaults>
</compile_context>

<pallas_src>
import functools

import jax
import jax.numpy as jnp
from jax import lax
from jax.experimental import pallas as pl
from jax.experimental.pallas import tpu as pltpu


def _round_up(x, m):
    return (x + m - 1) // m * m


# ---------------------------------------------------------------------------
# Fused CAB kernel: one grid step per batch element.
#   x_ref  : (1, C, H*W)    lane-dense input block (NCHW flattened)
#   w1_ref : (C, 9*C)       conv1 weights, columns ordered (ky, kx, cin)
#   w2_ref : (C, 9*C)       conv2 weights
#   wd_ref : (Cr, C)        squeeze 1x1   (f32)
#   wu_ref : (C, Cr)        excite 1x1    (f32)
#   o_ref  : (1, C, H*W)    lane-dense output block
# scratch:
#   xpad_ref, r1pad_ref : (C, H*W + 2*pad)  row-halo buffers (zero borders)
#   col_ref             : (9*C, T*W)        transposed im2col buffer (per tile)
#   res_ref             : (C, H*W)          conv2 output, kept f32 for GAP/scale
# ---------------------------------------------------------------------------
def _cab_kernel(x_ref, w1_ref, w2_ref, wd_ref, wu_ref, o_ref,
                xpad_ref, r1pad_ref, col_ref, res_ref,
                *, H, W, C, T, pad):
    HW = H * W
    TW = T * W
    n_tiles = H // T
    cdt = xpad_ref.dtype

    # ---- border-only zeroing of the halo buffers (aligned 128-lane slabs) ----
    zero_border = jnp.zeros((C, pad), cdt)
    xpad_ref[:, :pad] = zero_border
    xpad_ref[:, pad + HW:] = zero_border
    r1pad_ref[:, :pad] = zero_border
    r1pad_ref[:, pad + HW:] = zero_border

    # ---- read the input block once; interior store is 128-lane aligned ------
    xpad_ref[:, pad:pad + HW] = x_ref[0]

    # ---- column-wrap masks (hoisted; depend only on w = p mod W) ------------
    lane = lax.broadcasted_iota(jnp.int32, (1, TW), 1)
    wcol = (lane & (W - 1)) if (W & (W - 1)) == 0 else (lane % W)
    mask_r = wcol < (W - 1)      # valid lanes for a dx = +1 tap
    mask_l = wcol > 0            # valid lanes for a dx = -1 tap

    def im2col(src_ref, t):
        # col[k*C:(k+1)*C, :] = tap (dy, dx) of output-row tile t, lane-dense.
        for k in range(9):
            dy, dx = k // 3 - 1, k % 3 - 1
            start = pad + (t * T + dy) * W + dx
            tap = src_ref[:, start:start + TW]
            if dx == 1:
                tap = jnp.where(mask_r, tap, 0)
            elif dx == -1:
                tap = jnp.where(mask_l, tap, 0)
            col_ref[k * C:(k + 1) * C, :] = tap

    # ---- pass 1: conv1 (3x3, SAME, no bias) + ReLU -> r1pad interior --------
    for t in range(n_tiles):
        im2col(xpad_ref, t)
        r1 = jnp.dot(w1_ref[...], col_ref[...],
                     preferred_element_type=jnp.float32)
        r1 = jnp.maximum(r1, 0.0)                       # act = ReLU
        r1pad_ref[:, pad + t * TW:pad + (t + 1) * TW] = r1.astype(cdt)

    # ---- pass 2: conv2 (3x3, SAME, no bias) -> res (kept f32) ---------------
    for t in range(n_tiles):
        im2col(r1pad_ref, t)
        res_ref[:, t * TW:(t + 1) * TW] = jnp.dot(
            w2_ref[...], col_ref[...], preferred_element_type=jnp.float32)

    # ---- channel attention: GAP (ones-matmul) -> 1x1 -> ReLU -> 1x1 -> sigmoid
    res = res_ref[...]
    ones_hw = jnp.ones((HW, 1), jnp.float32)
    gap = jnp.dot(res, ones_hw, preferred_element_type=jnp.float32) * (1.0 / HW)
    z = jnp.maximum(
        jnp.dot(wd_ref[...], gap, preferred_element_type=jnp.float32), 0.0)
    s_lin = jnp.dot(wu_ref[...], z, preferred_element_type=jnp.float32)
    s = 1.0 / (1.0 + jnp.exp(-jnp.clip(s_lin, -30.0, 30.0)))       # (C, 1)

    # ---- scale + residual, fully lane-dense (C, H*W) ------------------------
    x_res = xpad_ref[:, pad:pad + HW].astype(jnp.float32)
    o_ref[0] = (res * s + x_res).astype(o_ref.dtype)


def _pick_row_tile(H, W, C, itemsize, budget_bytes=8 << 20):
    """Largest row tile T with H % T == 0, (T*W) % 128 == 0 and the (9C, T*W)
    im2col buffer under `budget_bytes` (shrink the budget for v7x's 64 MiB VMEM)."""
    cands = [t for t in range(1, H + 1) if H % t == 0 and (t * W) % 128 == 0]
    if not cands:
        raise ValueError(f"no valid row tile for H={H}, W={W} "
                         "(need H % T == 0 and (T*W) % 128 == 0)")
    fitting = [t for t in cands if 9 * C * t * W * itemsize <= budget_bytes]
    return max(fitting) if fitting else min(cands)


def cab_forward(x_nchw, params, *, compute_dtype=None, row_tile=None):
    """Fused CAB forward.

    x: (N, C, H, W)  (PyTorch NCHW layout)
    params: w_conv1/w_conv2 (C, C, 3, 3) OIHW; w_ca_down (Cr, C, 1, 1);
            w_ca_up (C, Cr, 1, 1).
    compute_dtype: conv activation/weight dtype (e.g. jnp.bfloat16 on v6e/v7x);
            matmuls always accumulate in f32, attention path stays f32.
    """
    N, C, H, W = x_nchw.shape
    assert C % 8 == 0, "C must be a multiple of 8 (sublane tiling)"
    cd = jnp.dtype(compute_dtype) if compute_dtype is not None else x_nchw.dtype
    Cr = params["w_ca_down"].shape[0]

    itemsize = jnp.dtype(cd).itemsize
    T = row_tile if row_tile is not None else _pick_row_tile(H, W, C, itemsize)
    assert H % T == 0 and (T * W) % 128 == 0, f"bad row tile {T}"
    pad = _round_up(W + 1, 128)           # halo border, kept 128-lane aligned
    HW = H * W

    # Lane-dense presentation (free reshapes of contiguous arrays) + host-side
    # weight re-layout to the (cout, (ky, kx, cin)) im2col order.
    x2 = x_nchw.reshape(N, C, HW).astype(cd)
    w1t = jnp.transpose(params["w_conv1"], (0, 2, 3, 1)).reshape(C, 9 * C).astype(cd)
    w2t = jnp.transpose(params["w_conv2"], (0, 2, 3, 1)).reshape(C, 9 * C).astype(cd)
    wd = params["w_ca_down"].reshape(Cr, C).astype(jnp.float32)
    wu = params["w_ca_up"].reshape(C, Cr).astype(jnp.float32)

    kernel = functools.partial(_cab_kernel, H=H, W=W, C=C, T=T, pad=pad)
    out2 = pl.pallas_call(
        kernel,
        out_shape=jax.ShapeDtypeStruct((N, C, HW), cd),
        grid_spec=pltpu.PrefetchScalarGridSpec(
            num_scalar_prefetch=0,
            grid=(N,),
            in_specs=[
                pl.BlockSpec((1, C, HW), lambda n: (n, 0, 0)),
                pl.BlockSpec((C, 9 * C), lambda n: (0, 0)),
                pl.BlockSpec((C, 9 * C), lambda n: (0, 0)),
                pl.BlockSpec((Cr, C), lambda n: (0, 0)),
                pl.BlockSpec((C, Cr), lambda n: (0, 0)),
            ],
            out_specs=pl.BlockSpec((1, C, HW), lambda n: (n, 0, 0)),
            scratch_shapes=[
                pltpu.VMEM((C, HW + 2 * pad), cd),     # xpad  (row-halo input)
                pltpu.VMEM((C, HW + 2 * pad), cd),     # r1pad (row-halo conv1)
                pltpu.VMEM((9 * C, T * W), cd),        # im2col buffer, per tile
                pltpu.VMEM((C, HW), jnp.float32),      # res (f32 for GAP/scale)
            ],
        ),
        compiler_params=pltpu.CompilerParams(
            dimension_semantics=("parallel",)),        # batch across megacores
    )(x2, w1t, w2t, wd, wu)
    return out2.reshape(N, C, H, W)


# ---------------------------------------------------------------------------
# Pure-JAX reference (same math, NCHW) for the correctness check.
# ---------------------------------------------------------------------------
def cab_reference(x, params):
    dn = ("NCHW", "OIHW", "NCHW")

    def conv3(v, w):
        return lax.conv_general_dilated(v, w, window_strides=(1, 1),
                                        padding="SAME", dimension_numbers=dn)

    res = jnp.maximum(conv3(x, params["w_conv1"]), 0.0)
    res = conv3(res, params["w_conv2"])
    y = jnp.mean(res, axis=(2, 3), keepdims=True)                 # (N, C, 1, 1)
    y = jnp.maximum(lax.conv_general_dilated(
        y, params["w_ca_down"], (1, 1), "VALID", dimension_numbers=dn), 0.0)
    y = jax.nn.sigmoid(lax.conv_general_dilated(
        y, params["w_ca_up"], (1, 1), "VALID", dimension_numbers=dn))
    return res * y + x


if __name__ == "__main__":
    # Shapes consistent with the module: n_feat=32, kernel_size=3, reduction=8,
    # bias=False, act=ReLU.
    N, C, H, W = 2, 32, 16, 16
    reduction = 8
    Cr = C // reduction

    key = jax.random.PRNGKey(0)
    k0, k1, k2, k3, k4 = jax.random.split(key, 5)

    x = jax.random.normal(k0, (N, C, H, W), dtype=jnp.float32)
    params = {
        "w_conv1": jax.random.normal(k1, (C, C, 3, 3), jnp.float32) * 0.05,
        "w_conv2": jax.random.normal(k2, (C, C, 3, 3), jnp.float32) * 0.05,
        "w_ca_down": jax.random.normal(k3, (Cr, C, 1, 1), jnp.float32) * 0.1,
        "w_ca_up": jax.random.normal(k4, (C, Cr, 1, 1), jnp.float32) * 0.1,
    }

    ref = jax.block_until_ready(cab_reference(x, params))

    # f32 path, explicitly exercising the in-kernel row-tiling (2 tiles of 8 rows).
    out = jax.block_until_ready(cab_forward(x, params, row_tile=8))
    if out.shape != (N, C, H, W):
        raise AssertionError(f"bad output shape {out.shape}")
    if not jnp.allclose(out, ref, atol=1e-4, rtol=1e-4):
        err = jnp.max(jnp.abs(out - ref))
        raise AssertionError(f"f32 Pallas CAB mismatch vs reference, max err {err}")

    # bf16 compute path (v6e/v7x perf mode): bf16 activations/conv weights,
    # f32 MXU accumulation, attention in f32.  Loose tolerance for bf16 rounding.
    out_bf = jax.block_until_ready(
        cab_forward(x, params, compute_dtype=jnp.bfloat16))
    if not jnp.allclose(out_bf.astype(jnp.float32), ref, atol=1e-1, rtol=1e-1):
        err = jnp.max(jnp.abs(out_bf.astype(jnp.float32) - ref))
        raise AssertionError(f"bf16 Pallas CAB mismatch vs reference, max err {err}")

    print("KERNEL_OK")
</pallas_src>

<mosaic_0001>
module attributes {stable_mosaic.version = 11 : i64} {
  func.func @_cab_kernel(%arg0: i32, %arg1: memref<1x32x256xf32, #tpu.memory_space<vmem>>, %arg2: memref<32x288xf32, #tpu.memory_space<vmem>>, %arg3: memref<32x288xf32, #tpu.memory_space<vmem>>, %arg4: memref<4x32xf32, #tpu.memory_space<vmem>>, %arg5: memref<32x4xf32, #tpu.memory_space<vmem>>, %arg6: memref<1x32x256xf32, #tpu.memory_space<vmem>>, %arg7: memref<32x512xf32, #tpu.memory_space<vmem>>, %arg8: memref<32x512xf32, #tpu.memory_space<vmem>>, %arg9: memref<288x128xf32, #tpu.memory_space<vmem>>, %arg10: memref<32x256xf32, #tpu.memory_space<vmem>>) attributes {dimension_semantics = [#tpu.dimension_semantics<parallel>], iteration_bounds = array<i64: 2>, scalar_prefetch = 0 : i64, scratch_operands = 4 : i64, tpu.core_type = #tpu.core_type<tc>, window_params = [{transform_indices = @transform_0, window_bounds = array<i64: 1, 32, 256>}, {pipeline_mode = #tpu.pipeline_mode<synchronous>, transform_indices = @transform_1, window_bounds = array<i64: 32, 288>}, {pipeline_mode = #tpu.pipeline_mode<synchronous>, transform_indices = @transform_2, window_bounds = array<i64: 32, 288>}, {pipeline_mode = #tpu.pipeline_mode<synchronous>, transform_indices = @transform_3, window_bounds = array<i64: 4, 32>}, {pipeline_mode = #tpu.pipeline_mode<synchronous>, transform_indices = @transform_4, window_bounds = array<i64: 32, 4>}, {transform_indices = @transform_5, window_bounds = array<i64: 1, 32, 256>}]} {
    %cst = arith.constant 0.000000e+00 : f32
    %0 = vector.broadcast %cst : f32 to vector<32x128xf32>
    %c0 = arith.constant 0 : index
    %c0_0 = arith.constant 0 : index
    %1 = vector.load %arg7[%c0, %c0_0] : memref<32x512xf32, #tpu.memory_space<vmem>>, vector<32x128xf32>
    tpu.vector_store %arg7[%c0, %c0_0], %0 {strides = array<i32>} : memref<32x512xf32, #tpu.memory_space<vmem>>, vector<32x128xf32>,
    %c0_1 = arith.constant 0 : index
    %c384 = arith.constant 384 : index
    %2 = vector.load %arg7[%c0_1, %c384] : memref<32x512xf32, #tpu.memory_space<vmem>>, vector<32x128xf32>
    tpu.vector_store %arg7[%c0_1, %c384], %0 {strides = array<i32>} : memref<32x512xf32, #tpu.memory_space<vmem>>, vector<32x128xf32>,
    %c0_2 = arith.constant 0 : index
    %c0_3 = arith.constant 0 : index
    %3 = vector.load %arg8[%c0_2, %c0_3] : memref<32x512xf32, #tpu.memory_space<vmem>>, vector<32x128xf32>
    tpu.vector_store %arg8[%c0_2, %c0_3], %0 {strides = array<i32>} : memref<32x512xf32, #tpu.memory_space<vmem>>, vector<32x128xf32>,
    %c0_4 = arith.constant 0 : index
    %c384_5 = arith.constant 384 : index
    %4 = vector.load %arg8[%c0_4, %c384_5] : memref<32x512xf32, #tpu.memory_space<vmem>>, vector<32x128xf32>
    tpu.vector_store %arg8[%c0_4, %c384_5], %0 {strides = array<i32>} : memref<32x512xf32, #tpu.memory_space<vmem>>, vector<32x128xf32>,
    %c0_6 = arith.constant 0 : index
    %c0_7 = arith.constant 0 : index
    %c0_8 = arith.constant 0 : index
    %5 = vector.load %arg1[%c0_6, %c0_7, %c0_8] : memref<1x32x256xf32, #tpu.memory_space<vmem>>, vector<1x32x256xf32>
    %6 = vector.shape_cast %5 : vector<1x32x256xf32> to vector<32x256xf32>
    %c0_9 = arith.constant 0 : index
    %c128 = arith.constant 128 : index
    %7 = vector.load %arg7[%c0_9, %c128] : memref<32x512xf32, #tpu.memory_space<vmem>>, vector<32x256xf32>
    tpu.vector_store %arg7[%c0_9, %c128], %6 {strides = array<i32>} : memref<32x512xf32, #tpu.memory_space<vmem>>, vector<32x256xf32>,
    %8 = tpu.iota {dimensions = array<i32: 1>} : vector<1x128xi32>
    %c15_i32 = arith.constant 15 : i32
    %9 = vector.broadcast %c15_i32 : i32 to vector<1x128xi32>
    %10 = arith.andi %8, %9 : vector<1x128xi32>
    %c15_i32_10 = arith.constant 15 : i32
    %11 = vector.broadcast %c15_i32_10 : i32 to vector<1x128xi32>
    %12 = arith.cmpi slt, %10, %11 : vector<1x128xi32>
    %c0_i32 = arith.constant 0 : i32
    %13 = vector.broadcast %c0_i32 : i32 to vector<1x128xi32>
    %14 = arith.cmpi sgt, %10, %13 : vector<1x128xi32>
    %c0_11 = arith.constant 0 : index
    %c111 = arith.constant 111 : index
    %15 = vector.load %arg7[%c0_11, %c111] : memref<32x512xf32, #tpu.memory_space<vmem>>, vector<32x128xf32>
    %c0_i32_12 = arith.constant 0 : i32
    %16 = arith.sitofp %c0_i32_12 : i32 to f32
    %17 = vector.shape_cast %14 : vector<1x128xi1> to vector<1x128xi1>
    %18 = vector.broadcast %17 : vector<1x128xi1> to vector<32x128xi1>
    %19 = vector.broadcast %16 : f32 to vector<32x128xf32>
    %20 = arith.select %18, %15, %19 : vector<32x128xi1>, vector<32x128xf32>
    %c0_13 = arith.constant 0 : index
    %c0_14 = arith.constant 0 : index
    %21 = vector.load %arg9[%c0_13, %c0_14] : memref<288x128xf32, #tpu.memory_space<vmem>>, vector<32x128xf32>
    tpu.vector_store %arg9[%c0_13, %c0_14], %20 {strides = array<i32>} : memref<288x128xf32, #tpu.memory_space<vmem>>, vector<32x128xf32>,
    %c0_15 = arith.constant 0 : index
    %c112 = arith.constant 112 : index
    %22 = vector.load %arg7[%c0_15, %c112] : memref<32x512xf32, #tpu.memory_space<vmem>>, vector<32x128xf32>
    %c32 = arith.constant 32 : index
    %c0_16 = arith.constant 0 : index
    %23 = vector.load %arg9[%c32, %c0_16] : memref<288x128xf32, #tpu.memory_space<vmem>>, vector<32x128xf32>
    tpu.vector_store %arg9[%c32, %c0_16], %22 {strides = array<i32>} : memref<288x128xf32, #tpu.memory_space<vmem>>, vector<32x128xf32>,
    %c0_17 = arith.constant 0 : index
    %c113 = arith.constant 113 : index
    %24 = vector.load %arg7[%c0_17, %c113] : memref<32x512xf32, #tpu.memory_space<vmem>>, vector<32x128xf32>
    %c0_i32_18 = arith.constant 0 : i32
    %25 = arith.sitofp %c0_i32_18 : i32 to f32
    %26 = vector.shape_cast %12 : vector<1x128xi1> to vector<1x128xi1>
    %27 = vector.broadcast %26 : vector<1x128xi1> to vector<32x128xi1>
    %28 = vector.broadcast %25 : f32 to vector<32x128xf32>
    %29 = arith.select %27, %24, %28 : vector<32x128xi1>, vector<32x128xf32>
    %c64 = arith.constant 64 : index
    %c0_19 = arith.constant 0 : index
    %30 = vector.load %arg9[%c64, %c0_19] : memref<288x128xf32, #tpu.memory_space<vmem>>, vector<32x128xf32>
    tpu.vector_store %arg9[%c64, %c0_19], %29 {strides = array<i32>} : memref<288x128xf32, #tpu.memory_space<vmem>>, vector<32x128xf32>,
    %c0_20 = arith.constant 0 : index
    %c127 = arith.constant 127 : index
    %31 = vector.load %arg7[%c0_20, %c127] : memref<32x512xf32, #tpu.memory_space<vmem>>, vector<32x128xf32>
    %c0_i32_21 = arith.constant 0 : i32
    %32 = arith.sitofp %c0_i32_21 : i32 to f32
    %33 = vector.shape_cast %14 : vector<1x128xi1> to vector<1x128xi1>
    %34 = vector.broadcast %33 : vector<1x128xi1> to vector<32x128xi1>
    %35 = vector.broadcast %32 : f32 to vector<32x128xf32>
    %36 = arith.select %34, %31, %35 : vector<32x128xi1>, vector<32x128xf32>
    %c96 = arith.constant 96 : index
    %c0_22 = arith.constant 0 : index
    %37 = vector.load %arg9[%c96, %c0_22] : memref<288x128xf32, #tpu.memory_space<vmem>>, vector<32x128xf32>
    tpu.vector_store %arg9[%c96, %c0_22], %36 {strides = array<i32>} : memref<288x128xf32, #tpu.memory_space<vmem>>, vector<32x128xf32>,
    %c0_23 = arith.constant 0 : index
    %c128_24 = arith.constant 128 : index
    %38 = vector.load %arg7[%c0_23, %c128_24] : memref<32x512xf32, #tpu.memory_space<vmem>>, vector<32x128xf32>
    %c128_25 = arith.constant 128 : index
    %c0_26 = arith.constant 0 : index
    %39 = vector.load %arg9[%c128_25, %c0_26] : memref<288x128xf32, #tpu.memory_space<vmem>>, vector<32x128xf32>
    tpu.vector_store %arg9[%c128_25, %c0_26], %38 {strides = array<i32>} : memref<288x128xf32, #tpu.memory_space<vmem>>, vector<32x128xf32>,
    %c0_27 = arith.constant 0 : index
    %c129 = arith.constant 129 : index
    %40 = vector.load %arg7[%c0_27, %c129] : memref<32x512xf32, #tpu.memory_space<vmem>>, vector<32x128xf32>
    %c0_i32_28 = arith.constant 0 : i32
    %41 = arith.sitofp %c0_i32_28 : i32 to f32
    %42 = vector.shape_cast %12 : vector<1x128xi1> to vector<1x128xi1>
    %43 = vector.broadcast %42 : vector<1x128xi1> to vector<32x128xi1>
    %44 = vector.broadcast %41 : f32 to vector<32x128xf32>
    %45 = arith.select %43, %40, %44 : vector<32x128xi1>, vector<32x128xf32>
    %c160 = arith.constant 160 : index
    %c0_29 = arith.constant 0 : index
    %46 = vector.load %arg9[%c160, %c0_29] : memref<288x128xf32, #tpu.memory_space<vmem>>, vector<32x128xf32>
    tpu.vector_store %arg9[%c160, %c0_29], %45 {strides = array<i32>} : memref<288x128xf32, #tpu.memory_space<vmem>>, vector<32x128xf32>,
    %c0_30 = arith.constant 0 : index
    %c143 = arith.constant 143 : index
    %47 = vector.load %arg7[%c0_30, %c143] : memref<32x512xf32, #tpu.memory_space<vmem>>, vector<32x128xf32>
    %c0_i32_31 = arith.constant 0 : i32
    %48 = arith.sitofp %c0_i32_31 : i32 to f32
    %49 = vector.shape_cast %14 : vector<1x128xi1> to vector<1x128xi1>
    %50 = vector.broadcast %49 : vector<1x128xi1> to vector<32x128xi1>
    %51 = vector.broadcast %48 : f32 to vector<32x128xf32>
    %52 = arith.select %50, %47, %51 : vector<32x128xi1>, vector<32x128xf32>
    %c192 = arith.constant 192 : index
    %c0_32 = arith.constant 0 : index
    %53 = vector.load %arg9[%c192, %c0_32] : memref<288x128xf32, #tpu.memory_space<vmem>>, vector<32x128xf32>
    tpu.vector_store %arg9[%c192, %c0_32], %52 {strides = array<i32>} : memref<288x128xf32, #tpu.memory_space<vmem>>, vector<32x128xf32>,
    %c0_33 = arith.constant 0 : index
    %c144 = arith.constant 144 : index
    %54 = vector.load %arg7[%c0_33, %c144] : memref<32x512xf32, #tpu.memory_space<vmem>>, vector<32x128xf32>
    %c224 = arith.constant 224 : index
    %c0_34 = arith.constant 0 : index
    %55 = vector.load %arg9[%c224, %c0_34] : memref<288x128xf32, #tpu.memory_space<vmem>>, vector<32x128xf32>
    tpu.vector_store %arg9[%c224, %c0_34], %54 {strides = array<i32>} : memref<288x128xf32, #tpu.memory_space<vmem>>, vector<32x128xf32>,
    %c0_35 = arith.constant 0 : index
    %c145 = arith.constant 145 : index
    %56 = vector.load %arg7[%c0_35, %c145] : memref<32x512xf32, #tpu.memory_space<vmem>>, vector<32x128xf32>
    %c0_i32_36 = arith.constant 0 : i32
    %57 = arith.sitofp %c0_i32_36 : i32 to f32
    %58 = vector.shape_cast %12 : vector<1x128xi1> to vector<1x128xi1>
    %59 = vector.broadcast %58 : vector<1x128xi1> to vector<32x128xi1>
    %60 = vector.broadcast %57 : f32 to vector<32x128xf32>
    %61 = arith.select %59, %56, %60 : vector<32x128xi1>, vector<32x128xf32>
    %c256 = arith.constant 256 : index
    %c0_37 = arith.constant 0 : index
    %62 = vector.load %arg9[%c256, %c0_37] : memref<288x128xf32, #tpu.memory_space<vmem>>, vector<32x128xf32>
    tpu.vector_store %arg9[%c256, %c0_37], %61 {strides = array<i32>} : memref<288x128xf32, #tpu.memory_space<vmem>>, vector<32x128xf32>,
    %c0_38 = arith.constant 0 : index
    %c0_39 = arith.constant 0 : index
    %63 = vector.load %arg2[%c0_38, %c0_39] : memref<32x288xf32, #tpu.memory_space<vmem>>, vector<32x288xf32>
    %c0_40 = arith.constant 0 : index
    %c0_41 = arith.constant 0 : index
    %64 = vector.load %arg9[%c0_40, %c0_41] : memref<288x128xf32, #tpu.memory_space<vmem>>, vector<288x128xf32>
    %cst_42 = arith.constant dense<0.000000e+00> : vector<32x128xf32>
    %65 = tpu.matmul %63, %64, %cst_42 {dimension_numbers = #tpu.dot_dimension_numbers<[1], [0], [0], [1], [0, 0, 1, 1], [], []>} : vector<32x288xf32>, vector<288x128xf32>, vector<32x128xf32> -> vector<32x128xf32>
    %cst_43 = arith.constant 0.000000e+00 : f32
    %66 = vector.broadcast %cst_43 : f32 to vector<32x128xf32>
    %67 = arith.maximumf %65, %66 : vector<32x128xf32>
    %c0_44 = arith.constant 0 : index
    %c128_45 = arith.constant 128 : index
    %68 = vector.load %arg8[%c0_44, %c128_45] : memref<32x512xf32, #tpu.memory_space<vmem>>, vector<32x128xf32>
    tpu.vector_store %arg8[%c0_44, %c128_45], %67 {strides = array<i32>} : memref<32x512xf32, #tpu.memory_space<vmem>>, vector<32x128xf32>,
    %c0_46 = arith.constant 0 : index
    %c239 = arith.constant 239 : index
    %69 = vector.load %arg7[%c0_46, %c239] : memref<32x512xf32, #tpu.memory_space<vmem>>, vector<32x128xf32>
    %c0_i32_47 = arith.constant 0 : i32
    %70 = arith.sitofp %c0_i32_47 : i32 to f32
    %71 = vector.shape_cast %14 : vector<1x128xi1> to vector<1x128xi1>
    %72 = vector.broadcast %71 : vector<1x128xi1> to vector<32x128xi1>
    %73 = vector.broadcast %70 : f32 to vector<32x128xf32>
    %74 = arith.select %72, %69, %73 : vector<32x128xi1>, vector<32x128xf32>
    %c0_48 = arith.constant 0 : index
    %c0_49 = arith.constant 0 : index
    %75 = vector.load %arg9[%c0_48, %c0_49] : memref<288x128xf32, #tpu.memory_space<vmem>>, vector<32x128xf32>
    tpu.vector_store %arg9[%c0_48, %c0_49], %74 {strides = array<i32>} : memref<288x128xf32, #tpu.memory_space<vmem>>, vector<32x128xf32>,
    %c0_50 = arith.constant 0 : index
    %c240 = arith.constant 240 : index
    %76 = vector.load %arg7[%c0_50, %c240] : memref<32x512xf32, #tpu.memory_space<vmem>>, vector<32x128xf32>
    %c32_51 = arith.constant 32 : index
    %c0_52 = arith.constant 0 : index
    %77 = vector.load %arg9[%c32_51, %c0_52] : memref<288x128xf32, #tpu.memory_space<vmem>>, vector<32x128xf32>
    tpu.vector_store %arg9[%c32_51, %c0_52], %76 {strides = array<i32>} : memref<288x128xf32, #tpu.memory_space<vmem>>, vector<32x128xf32>,
    %c0_53 = arith.constant 0 : index
    %c241 = arith.constant 241 : index
    %78 = vector.load %arg7[%c0_53, %c241] : memref<32x512xf32, #tpu.memory_space<vmem>>, vector<32x128xf32>
    %c0_i32_54 = arith.constant 0 : i32
    %79 = arith.sitofp %c0_i32_54 : i32 to f32
    %80 = vector.shape_cast %12 : vector<1x128xi1> to vector<1x128xi1>
    %81 = vector.broadcast %80 : vector<1x128xi1> to vector<32x128xi1>
    %82 = vector.broadcast %79 : f32 to vector<32x128xf32>
    %83 = arith.select %81, %78, %82 : vector<32x128xi1>, vector<32x128xf32>
    %c64_55 = arith.constant 64 : index
    %c0_56 = arith.constant 0 : index
    %84 = vector.load %arg9[%c64_55, %c0_56] : memref<288x128xf32, #tpu.memory_space<vmem>>, vector<32x128xf32>
    tpu.vector_store %arg9[%c64_55, %c0_56], %83 {strides = array<i32>} : memref<288x128xf32, #tpu.memory_space<vmem>>, vector<32x128xf32>,
    %c0_57 = arith.constant 0 : index
    %c255 = arith.constant 255 : index
    %85 = vector.load %arg7[%c0_57, %c255] : memref<32x512xf32, #tpu.memory_space<vmem>>, vector<32x128xf32>
    %c0_i32_58 = arith.constant 0 : i32
    %86 = arith.sitofp %c0_i32_58 : i32 to f32
    %87 = vector.shape_cast %14 : vector<1x128xi1> to vector<1x128xi1>
    %88 = vector.broadcast %87 : vector<1x128xi1> to vector<32x128xi1>
    %89 = vector.broadcast %86 : f32 to vector<32x128xf32>
    %90 = arith.select %88, %85, %89 : vector<32x128xi1>, vector<32x128xf32>
    %c96_59 = arith.constant 96 : index
    %c0_60 = arith.constant 0 : index
    %91 = vector.load %arg9[%c96_59, %c0_60] : memref<288x128xf32, #tpu.memory_space<vmem>>, vector<32x128xf32>
    tpu.vector_store %arg9[%c96_59, %c0_60], %90 {strides = array<i32>} : memref<288x128xf32, #tpu.memory_space<vmem>>, vector<32x128xf32>,
    %c0_61 = arith.constant 0 : index
    %c256_62 = arith.constant 256 : index
    %92 = vector.load %arg7[%c0_61, %c256_62] : memref<32x512xf32, #tpu.memory_space<vmem>>, vector<32x128xf32>
    %c128_63 = arith.constant 128 : index
    %c0_64 = arith.constant 0 : index
    %93 = vector.load %arg9[%c128_63, %c0_64] : memref<288x128xf32, #tpu.memory_space<vmem>>, vector<32x128xf32>
    tpu.vector_store %arg9[%c128_63, %c0_64], %92 {strides = array<i32>} : memref<288x128xf32, #tpu.memory_space<vmem>>, vector<32x128xf32>,
    %c0_65 = arith.constant 0 : index
    %c257 = arith.constant 257 : index
    %94 = vector.load %arg7[%c0_65, %c257] : memref<32x512xf32, #tpu.memory_space<vmem>>, vector<32x128xf32>
    %c0_i32_66 = arith.constant 0 : i32
    %95 = arith.sitofp %c0_i32_66 : i32 to f32
    %96 = vector.shape_cast %12 : vector<1x128xi1> to vector<1x128xi1>
    %97 = vector.broadcast %96 : vector<1x128xi1> to vector<32x128xi1>
    %98 = vector.broadcast %95 : f32 to vector<32x128xf32>
    %99 = arith.select %97, %94, %98 : vector<32x128xi1>, vector<32x128xf32>
    %c160_67 = arith.constant 160 : index
    %c0_68 = arith.constant 0 : index
    %100 = vector.load %arg9[%c160_67, %c0_68] : memref<288x128xf32, #tpu.memory_space<vmem>>, vector<32x128xf32>
    tpu.vector_store %arg9[%c160_67, %c0_68], %99 {strides = array<i32>} : memref<288x128xf32, #tpu.memory_space<vmem>>, vector<32x128xf32>,
    %c0_69 = arith.constant 0 : index
    %c271 = arith.constant 271 : index
    %101 = vector.load %arg7[%c0_69, %c271] : memref<32x512xf32, #tpu.memory_space<vmem>>, vector<32x128xf32>
    %c0_i32_70 = arith.constant 0 : i32
    %102 = arith.sitofp %c0_i32_70 : i32 to f32
    %103 = vector.shape_cast %14 : vector<1x128xi1> to vector<1x128xi1>
    %104 = vector.broadcast %103 : vector<1x128xi1> to vector<32x128xi1>
    %105 = vector.broadcast %102 : f32 to vector<32x128xf32>
    %106 = arith.select %104, %101, %105 : vector<32x128xi1>, vector<32x128xf32>
    %c192_71 = arith.constant 192 : index
    %c0_72 = arith.constant 0 : index
    %107 = vector.load %arg9[%c192_71, %c0_72] : memref<288x128xf32, #tpu.memory_space<vmem>>, vector<32x128xf32>
    tpu.vector_store %arg9[%c192_71, %c0_72], %106 {strides = array<i32>} : memref<288x128xf32, #tpu.memory_space<vmem>>, vector<32x128xf32>,
    %c0_73 = arith.constant 0 : index
    %c272 = arith.constant 272 : index
    %108 = vector.load %arg7[%c0_73, %c272] : memref<32x512xf32, #tpu.memory_space<vmem>>, vector<32x128xf32>
    %c224_74 = arith.constant 224 : index
    %c0_75 = arith.constant 0 : index
    %109 = vector.load %arg9[%c224_74, %c0_75] : memref<288x128xf32, #tpu.memory_space<vmem>>, vector<32x128xf32>
    tpu.vector_store %arg9[%c224_74, %c0_75], %108 {strides = array<i32>} : memref<288x128xf32, #tpu.memory_space<vmem>>, vector<32x128xf32>,
    %c0_76 = arith.constant 0 : index
    %c273 = arith.constant 273 : index
    %110 = vector.load %arg7[%c0_76, %c273] : memref<32x512xf32, #tpu.memory_space<vmem>>, vector<32x128xf32>
    %c0_i32_77 = arith.constant 0 : i32
    %111 = arith.sitofp %c0_i32_77 : i32 to f32
    %112 = vector.shape_cast %12 : vector<1x128xi1> to vector<1x128xi1>
    %113 = vector.broadcast %112 : vector<1x128xi1> to vector<32x128xi1>
    %114 = vector.broadcast %111 : f32 to vector<32x128xf32>
    %115 = arith.select %113, %110, %114 : vector<32x128xi1>, vector<32x128xf32>
    %c256_78 = arith.constant 256 : index
    %c0_79 = arith.constant 0 : index
    %116 = vector.load %arg9[%c256_78, %c0_79] : memref<288x128xf32, #tpu.memory_space<vmem>>, vector<32x128xf32>
    tpu.vector_store %arg9[%c256_78, %c0_79], %115 {strides = array<i32>} : memref<288x128xf32, #tpu.memory_space<vmem>>, vector<32x128xf32>,
    %c0_80 = arith.constant 0 : index
    %c0_81 = arith.constant 0 : index
    %117 = vector.load %arg2[%c0_80, %c0_81] : memref<32x288xf32, #tpu.memory_space<vmem>>, vector<32x288xf32>
    %c0_82 = arith.constant 0 : index
    %c0_83 = arith.constant 0 : index
    %118 = vector.load %arg9[%c0_82, %c0_83] : memref<288x128xf32, #tpu.memory_space<vmem>>, vector<288x128xf32>
    %cst_84 = arith.constant dense<0.000000e+00> : vector<32x128xf32>
    %119 = tpu.matmul %117, %118, %cst_84 {dimension_numbers = #tpu.dot_dimension_numbers<[1], [0], [0], [1], [0, 0, 1, 1], [], []>} : vector<32x288xf32>, vector<288x128xf32>, vector<32x128xf32> -> vector<32x128xf32>
    %cst_85 = arith.constant 0.000000e+00 : f32
    %120 = vector.broadcast %cst_85 : f32 to vector<32x128xf32>
    %121 = arith.maximumf %119, %120 : vector<32x128xf32>
    %c0_86 = arith.constant 0 : index
    %c256_87 = arith.constant 256 : index
    %122 = vector.load %arg8[%c0_86, %c256_87] : memref<32x512xf32, #tpu.memory_space<vmem>>, vector<32x128xf32>
    tpu.vector_store %arg8[%c0_86, %c256_87], %121 {strides = array<i32>} : memref<32x512xf32, #tpu.memory_space<vmem>>, vector<32x128xf32>,
    %c0_88 = arith.constant 0 : index
    %c111_89 = arith.constant 111 : index
    %123 = vector.load %arg8[%c0_88, %c111_89] : memref<32x512xf32, #tpu.memory_space<vmem>>, vector<32x128xf32>
    %c0_i32_90 = arith.constant 0 : i32
    %124 = arith.sitofp %c0_i32_90 : i32 to f32
    %125 = vector.shape_cast %14 : vector<1x128xi1> to vector<1x128xi1>
    %126 = vector.broadcast %125 : vector<1x128xi1> to vector<32x128xi1>
    %127 = vector.broadcast %124 : f32 to vector<32x128xf32>
    %128 = arith.select %126, %123, %127 : vector<32x128xi1>, vector<32x128xf32>
    %c0_91 = arith.constant 0 : index
    %c0_92 = arith.constant 0 : index
    %129 = vector.load %arg9[%c0_91, %c0_92] : memref<288x128xf32, #tpu.memory_space<vmem>>, vector<32x128xf32>
    tpu.vector_store %arg9[%c0_91, %c0_92], %128 {strides = array<i32>} : memref<288x128xf32, #tpu.memory_space<vmem>>, vector<32x128xf32>,
    %c0_93 = arith.constant 0 : index
    %c112_94 = arith.constant 112 : index
    %130 = vector.load %arg8[%c0_93, %c112_94] : memref<32x512xf32, #tpu.memory_space<vmem>>, vector<32x128xf32>
    %c32_95 = arith.constant 32 : index
    %c0_96 = arith.constant 0 : index
    %131 = vector.load %arg9[%c32_95, %c0_96] : memref<288x128xf32, #tpu.memory_space<vmem>>, vector<32x128xf32>
    tpu.vector_store %arg9[%c32_95, %c0_96], %130 {strides = array<i32>} : memref<288x128xf32, #tpu.memory_space<vmem>>, vector<32x128xf32>,
    %c0_97 = arith.constant 0 : index
    %c113_98 = arith.constant 113 : index
    %132 = vector.load %arg8[%c0_97, %c113_98] : memref<32x512xf32, #tpu.memory_space<vmem>>, vector<32x128xf32>
    %c0_i32_99 = arith.constant 0 : i32
    %133 = arith.sitofp %c0_i32_99 : i32 to f32
    %134 = vector.shape_cast %12 : vector<1x128xi1> to vector<1x128xi1>
    %135 = vector.broadcast %134 : vector<1x128xi1> to vector<32x128xi1>
    %136 = vector.broadcast %133 : f32 to vector<32x128xf32>
    %137 = arith.select %135, %132, %136 : vector<32x128xi1>, vector<32x128xf32>
    %c64_100 = arith.constant 64 : index
    %c0_101 = arith.constant 0 : index
    %138 = vector.load %arg9[%c64_100, %c0_101] : memref<288x128xf32, #tpu.memory_space<vmem>>, vector<32x128xf32>
    tpu.vector_store %arg9[%c64_100, %c0_101], %137 {strides = array<i32>} : memref<288x128xf32, #tpu.memory_space<vmem>>, vector<32x128xf32>,
    %c0_102 = arith.constant 0 : index
    %c127_103 = arith.constant 127 : index
    %139 = vector.load %arg8[%c0_102, %c127_103] : memref<32x512xf32, #tpu.memory_space<vmem>>, vector<32x128xf32>
    %c0_i32_104 = arith.constant 0 : i32
    %140 = arith.sitofp %c0_i32_104 : i32 to f32
    %141 = vector.shape_cast %14 : vector<1x128xi1> to vector<1x128xi1>
    %142 = vector.broadcast %141 : vector<1x128xi1> to vector<32x128xi1>
    %143 = vector.broadcast %140 : f32 to vector<32x128xf32>
    %144 = arith.select %142, %139, %143 : vector<32x128xi1>, vector<32x128xf32>
    %c96_105 = arith.constant 96 : index
    %c0_106 = arith.constant 0 : index
    %145 = vector.load %arg9[%c96_105, %c0_106] : memref<288x128xf32, #tpu.memory_space<vmem>>, vector<32x128xf32>
    tpu.vector_store %arg9[%c96_105, %c0_106], %144 {strides = array<i32>} : memref<288x128xf32, #tpu.memory_space<vmem>>, vector<32x128xf32>,
    %c0_107 = arith.constant 0 : index
    %c128_108 = arith.constant 128 : index
    %146 = vector.load %arg8[%c0_107, %c128_108] : memref<32x512xf32, #tpu.memory_space<vmem>>, vector<32x128xf32>
    %c128_109 = arith.constant 128 : index
    %c0_110 = arith.constant 0 : index
    %147 = vector.load %arg9[%c128_109, %c0_110] : memref<288x128xf32, #tpu.memory_space<vmem>>, vector<32x128xf32>
    tpu.vector_store %arg9[%c128_109, %c0_110], %146 {strides = array<i32>} : memref<288x128xf32, #tpu.memory_space<vmem>>, vector<32x128xf32>,
    %c0_111 = arith.constant 0 : index
    %c129_112 = arith.constant 129 : index
    %148 = vector.load %arg8[%c0_111, %c129_112] : memref<32x512xf32, #tpu.memory_space<vmem>>, vector<32x128xf32>
    %c0_i32_113 = arith.constant 0 : i32
    %149 = arith.sitofp %c0_i32_113 : i32 to f32
    %150 = vector.shape_cast %12 : vector<1x128xi1> to vector<1x128xi1>
    %151 = vector.broadcast %150 : vector<1x128xi1> to vector<32x128xi1>
    %152 = vector.broadcast %149 : f32 to vector<32x128xf32>
    %153 = arith.select %151, %148, %152 : vector<32x128xi1>, vector<32x128xf32>
    %c160_114 = arith.constant 160 : index
    %c0_115 = arith.constant 0 : index
    %154 = vector.load %arg9[%c160_114, %c0_115] : memref<288x128xf32, #tpu.memory_space<vmem>>, vector<32x128xf32>
    tpu.vector_store %arg9[%c160_114, %c0_115], %153 {strides = array<i32>} : memref<288x128xf32, #tpu.memory_space<vmem>>, vector<32x128xf32>,
    %c0_116 = arith.constant 0 : index
    %c143_117 = arith.constant 143 : index
    %155 = vector.load %arg8[%c0_116, %c143_117] : memref<32x512xf32, #tpu.memory_space<vmem>>, vector<32x128xf32>
    %c0_i32_118 = arith.constant 0 : i32
    %156 = arith.sitofp %c0_i32_118 : i32 to f32
    %157 = vector.shape_cast %14 : vector<1x128xi1> to vector<1x128xi1>
    %158 = vector.broadcast %157 : vector<1x128xi1> to vector<32x128xi1>
    %159 = vector.broadcast %156 : f32 to vector<32x128xf32>
    %160 = arith.select %158, %155, %159 : vector<32x128xi1>, vector<32x128xf32>
    %c192_119 = arith.constant 192 : index
    %c0_120 = arith.constant 0 : index
    %161 = vector.load %arg9[%c192_119, %c0_120] : memref<288x128xf32, #tpu.memory_space<vmem>>, vector<32x128xf32>
    tpu.vector_store %arg9[%c192_119, %c0_120], %160 {strides = array<i32>} : memref<288x128xf32, #tpu.memory_space<vmem>>, vector<32x128xf32>,
    %c0_121 = arith.constant 0 : index
    %c144_122 = arith.constant 144 : index
    %162 = vector.load %arg8[%c0_121, %c144_122] : memref<32x512xf32, #tpu.memory_space<vmem>>, vector<32x128xf32>
    %c224_123 = arith.constant 224 : index
    %c0_124 = arith.constant 0 : index
    %163 = vector.load %arg9[%c224_123, %c0_124] : memref<288x128xf32, #tpu.memory_space<vmem>>, vector<32x128xf32>
    tpu.vector_store %arg9[%c224_123, %c0_124], %162 {strides = array<i32>} : memref<288x128xf32, #tpu.memory_space<vmem>>, vector<32x128xf32>,
    %c0_125 = arith.constant 0 : index
    %c145_126 = arith.constant 145 : index
    %164 = vector.load %arg8[%c0_125, %c145_126] : memref<32x512xf32, #tpu.memory_space<vmem>>, vector<32x128xf32>
    %c0_i32_127 = arith.constant 0 : i32
    %165 = arith.sitofp %c0_i32_127 : i32 to f32
    %166 = vector.shape_cast %12 : vector<1x128xi1> to vector<1x128xi1>
    %167 = vector.broadcast %166 : vector<1x128xi1> to vector<32x128xi1>
    %168 = vector.broadcast %165 : f32 to vector<32x128xf32>
    %169 = arith.select %167, %164, %168 : vector<32x128xi1>, vector<32x128xf32>
    %c256_128 = arith.constant 256 : index
    %c0_129 = arith.constant 0 : index
    %170 = vector.load %arg9[%c256_128, %c0_129] : memref<288x128xf32, #tpu.memory_space<vmem>>, vector<32x128xf32>
    tpu.vector_store %arg9[%c256_128, %c0_129], %169 {strides = array<i32>} : memref<288x128xf32, #tpu.memory_space<vmem>>, vector<32x128xf32>,
    %c0_130 = arith.constant 0 : index
    %c0_131 = arith.constant 0 : index
    %171 = vector.load %arg3[%c0_130, %c0_131] : memref<32x288xf32, #tpu.memory_space<vmem>>, vector<32x288xf32>
    %c0_132 = arith.constant 0 : index
    %c0_133 = arith.constant 0 : index
    %172 = vector.load %arg9[%c0_132, %c0_133] : memref<288x128xf32, #tpu.memory_space<vmem>>, vector<288x128xf32>
    %cst_134 = arith.constant dense<0.000000e+00> : vector<32x128xf32>
    %173 = tpu.matmul %171, %172, %cst_134 {dimension_numbers = #tpu.dot_dimension_numbers<[1], [0], [0], [1], [0, 0, 1, 1], [], []>} : vector<32x288xf32>, vector<288x128xf32>, vector<32x128xf32> -> vector<32x128xf32>
    %c0_135 = arith.constant 0 : index
    %c0_136 = arith.constant 0 : index
    %174 = vector.load %arg10[%c0_135, %c0_136] : memref<32x256xf32, #tpu.memory_space<vmem>>, vector<32x128xf32>
    tpu.vector_store %arg10[%c0_135, %c0_136], %173 {strides = array<i32>} : memref<32x256xf32, #tpu.memory_space<vmem>>, vector<32x128xf32>,
    %c0_137 = arith.constant 0 : index
    %c239_138 = arith.constant 239 : index
    %175 = vector.load %arg8[%c0_137, %c239_138] : memref<32x512xf32, #tpu.memory_space<vmem>>, vector<32x128xf32>
    %c0_i32_139 = arith.constant 0 : i32
    %176 = arith.sitofp %c0_i32_139 : i32 to f32
    %177 = vector.shape_cast %14 : vector<1x128xi1> to vector<1x128xi1>
    %178 = vector.broadcast %177 : vector<1x128xi1> to vector<32x128xi1>
    %179 = vector.broadcast %176 : f32 to vector<32x128xf32>
    %180 = arith.select %178, %175, %179 : vector<32x128xi1>, vector<32x128xf32>
    %c0_140 = arith.constant 0 : index
    %c0_141 = arith.constant 0 : index
    %181 = vector.load %arg9[%c0_140, %c0_141] : memref<288x128xf32, #tpu.memory_space<vmem>>, vector<32x128xf32>
    tpu.vector_store %arg9[%c0_140, %c0_141], %180 {strides = array<i32>} : memref<288x128xf32, #tpu.memory_space<vmem>>, vector<32x128xf32>,
    %c0_142 = arith.constant 0 : index
    %c240_143 = arith.constant 240 : index
    %182 = vector.load %arg8[%c0_142, %c240_143] : memref<32x512xf32, #tpu.memory_space<vmem>>, vector<32x128xf32>
    %c32_144 = arith.constant 32 : index
    %c0_145 = arith.constant 0 : index
    %183 = vector.load %arg9[%c32_144, %c0_145] : memref<288x128xf32, #tpu.memory_space<vmem>>, vector<32x128xf32>
    tpu.vector_store %arg9[%c32_144, %c0_145], %182 {strides = array<i32>} : memref<288x128xf32, #tpu.memory_space<vmem>>, vector<32x128xf32>,
    %c0_146 = arith.constant 0 : index
    %c241_147 = arith.constant 241 : index
    %184 = vector.load %arg8[%c0_146, %c241_147] : memref<32x512xf32, #tpu.memory_space<vmem>>, vector<32x128xf32>
    %c0_i32_148 = arith.constant 0 : i32
    %185 = arith.sitofp %c0_i32_148 : i32 to f32
    %186 = vector.shape_cast %12 : vector<1x128xi1> to vector<1x128xi1>
    %187 = vector.broadcast %186 : vector<1x128xi1> to vector<32x128xi1>
    %188 = vector.broadcast %185 : f32 to vector<32x128xf32>
    %189 = arith.select %187, %184, %188 : vector<32x128xi1>, vector<32x128xf32>
    %c64_149 = arith.constant 64 : index
    %c0_150 = arith.constant 0 : index
    %190 = vector.load %arg9[%c64_149, %c0_150] : memref<288x128xf32, #tpu.memory_space<vmem>>, vector<32x128xf32>
    tpu.vector_store %arg9[%c64_149, %c0_150], %189 {strides = array<i32>} : memref<288x128xf32, #tpu.memory_space<vmem>>, vector<32x128xf32>,
    %c0_151 = arith.constant 0 : index
    %c255_152 = arith.constant 255 : index
    %191 = vector.load %arg8[%c0_151, %c255_152] : memref<32x512xf32, #tpu.memory_space<vmem>>, vector<32x128xf32>
    %c0_i32_153 = arith.constant 0 : i32
    %192 = arith.sitofp %c0_i32_153 : i32 to f32
    %193 = vector.shape_cast %14 : vector<1x128xi1> to vector<1x128xi1>
    %194 = vector.broadcast %193 : vector<1x128xi1> to vector<32x128xi1>
    %195 = vector.broadcast %192 : f32 to vector<32x128xf32>
    %196 = arith.select %194, %191, %195 : vector<32x128xi1>, vector<32x128xf32>
    %c96_154 = arith.constant 96 : index
    %c0_155 = arith.constant 0 : index
    %197 = vector.load %arg9[%c96_154, %c0_155] : memref<288x128xf32, #tpu.memory_space<vmem>>, vector<32x128xf32>
    tpu.vector_store %arg9[%c96_154, %c0_155], %196 {strides = array<i32>} : memref<288x128xf32, #tpu.memory_space<vmem>>, vector<32x128xf32>,
    %c0_156 = arith.constant 0 : index
    %c256_157 = arith.constant 256 : index
    %198 = vector.load %arg8[%c0_156, %c256_157] : memref<32x512xf32, #tpu.memory_space<vmem>>, vector<32x128xf32>
    %c128_158 = arith.constant 128 : index
    %c0_159 = arith.constant 0 : index
    %199 = vector.load %arg9[%c128_158, %c0_159] : memref<288x128xf32, #tpu.memory_space<vmem>>, vector<32x128xf32>
    tpu.vector_store %arg9[%c128_158, %c0_159], %198 {strides = array<i32>} : memref<288x128xf32, #tpu.memory_space<vmem>>, vector<32x128xf32>,
    %c0_160 = arith.constant 0 : index
    %c257_161 = arith.constant 257 : index
    %200 = vector.load %arg8[%c0_160, %c257_161] : memref<32x512xf32, #tpu.memory_space<vmem>>, vector<32x128xf32>
    %c0_i32_162 = arith.constant 0 : i32
    %201 = arith.sitofp %c0_i32_162 : i32 to f32
    %202 = vector.shape_cast %12 : vector<1x128xi1> to vector<1x128xi1>
    %203 = vector.broadcast %202 : vector<1x128xi1> to vector<32x128xi1>
    %204 = vector.broadcast %201 : f32 to vector<32x128xf32>
    %205 = arith.select %203, %200, %204 : vector<32x128xi1>, vector<32x128xf32>
    %c160_163 = arith.constant 160 : index
    %c0_164 = arith.constant 0 : index
    %206 = vector.load %arg9[%c160_163, %c0_164] : memref<288x128xf32, #tpu.memory_space<vmem>>, vector<32x128xf32>
    tpu.vector_store %arg9[%c160_163, %c0_164], %205 {strides = array<i32>} : memref<288x128xf32, #tpu.memory_space<vmem>>, vector<32x128xf32>,
    %c0_165 = arith.constant 0 : index
    %c271_166 = arith.constant 271 : index
    %207 = vector.load %arg8[%c0_165, %c271_166] : memref<32x512xf32, #tpu.memory_space<vmem>>, vector<32x128xf32>
    %c0_i32_167 = arith.constant 0 : i32
    %208 = arith.sitofp %c0_i32_167 : i32 to f32
    %209 = vector.shape_cast %14 : vector<1x128xi1> to vector<1x128xi1>
    %210 = vector.broadcast %209 : vector<1x128xi1> to vector<32x128xi1>
    %211 = vector.broadcast %208 : f32 to vector<32x128xf32>
    %212 = arith.select %210, %207, %211 : vector<32x128xi1>, vector<32x128xf32>
    %c192_168 = arith.constant 192 : index
    %c0_169 = arith.constant 0 : index
    %213 = vector.load %arg9[%c192_168, %c0_169] : memref<288x128xf32, #tpu.memory_space<vmem>>, vector<32x128xf32>
    tpu.vector_store %arg9[%c192_168, %c0_169], %212 {strides = array<i32>} : memref<288x128xf32, #tpu.memory_space<vmem>>, vector<32x128xf32>,
    %c0_170 = arith.constant 0 : index
    %c272_171 = arith.constant 272 : index
    %214 = vector.load %arg8[%c0_170, %c272_171] : memref<32x512xf32, #tpu.memory_space<vmem>>, vector<32x128xf32>
    %c224_172 = arith.constant 224 : index
    %c0_173 = arith.constant 0 : index
    %215 = vector.load %arg9[%c224_172, %c0_173] : memref<288x128xf32, #tpu.memory_space<vmem>>, vector<32x128xf32>
    tpu.vector_store %arg9[%c224_172, %c0_173], %214 {strides = array<i32>} : memref<288x128xf32, #tpu.memory_space<vmem>>, vector<32x128xf32>,
    %c0_174 = arith.constant 0 : index
    %c273_175 = arith.constant 273 : index
    %216 = vector.load %arg8[%c0_174, %c273_175] : memref<32x512xf32, #tpu.memory_space<vmem>>, vector<32x128xf32>
    %c0_i32_176 = arith.constant 0 : i32
    %217 = arith.sitofp %c0_i32_176 : i32 to f32
    %218 = vector.shape_cast %12 : vector<1x128xi1> to vector<1x128xi1>
    %219 = vector.broadcast %218 : vector<1x128xi1> to vector<32x128xi1>
    %220 = vector.broadcast %217 : f32 to vector<32x128xf32>
    %221 = arith.select %219, %216, %220 : vector<32x128xi1>, vector<32x128xf32>
    %c256_177 = arith.constant 256 : index
    %c0_178 = arith.constant 0 : index
    %222 = vector.load %arg9[%c256_177, %c0_178] : memref<288x128xf32, #tpu.memory_space<vmem>>, vector<32x128xf32>
    tpu.vector_store %arg9[%c256_177, %c0_178], %221 {strides = array<i32>} : memref<288x128xf32, #tpu.memory_space<vmem>>, vector<32x128xf32>,
    %c0_179 = arith.constant 0 : index
    %c0_180 = arith.constant 0 : index
    %223 = vector.load %arg3[%c0_179, %c0_180] : memref<32x288xf32, #tpu.memory_space<vmem>>, vector<32x288xf32>
    %c0_181 = arith.constant 0 : index
    %c0_182 = arith.constant 0 : index
    %224 = vector.load %arg9[%c0_181, %c0_182] : memref<288x128xf32, #tpu.memory_space<vmem>>, vector<288x128xf32>
    %cst_183 = arith.constant dense<0.000000e+00> : vector<32x128xf32>
    %225 = tpu.matmul %223, %224, %cst_183 {dimension_numbers = #tpu.dot_dimension_numbers<[1], [0], [0], [1], [0, 0, 1, 1], [], []>} : vector<32x288xf32>, vector<288x128xf32>, vector<32x128xf32> -> vector<32x128xf32>
    %c0_184 = arith.constant 0 : index
    %c128_185 = arith.constant 128 : index
    %226 = vector.load %arg10[%c0_184, %c128_185] : memref<32x256xf32, #tpu.memory_space<vmem>>, vector<32x128xf32>
    tpu.vector_store %arg10[%c0_184, %c128_185], %225 {strides = array<i32>} : memref<32x256xf32, #tpu.memory_space<vmem>>, vector<32x128xf32>,
    %c0_186 = arith.constant 0 : index
    %c0_187 = arith.constant 0 : index
    %227 = vector.load %arg10[%c0_186, %c0_187] : memref<32x256xf32, #tpu.memory_space<vmem>>, vector<32x256xf32>
    %cst_188 = arith.constant 1.000000e+00 : f32
    %228 = vector.broadcast %cst_188 : f32 to vector<256x1xf32>
    %cst_189 = arith.constant dense<0.000000e+00> : vector<32x1xf32>
    %229 = tpu.matmul %227, %228, %cst_189 {dimension_numbers = #tpu.dot_dimension_numbers<[1], [0], [0], [1], [0, 0, 1, 1], [], []>} : vector<32x256xf32>, vector<256x1xf32>, vector<32x1xf32> -> vector<32x1xf32>
    %cst_190 = arith.constant 3.906250e-03 : f32
    %230 = vector.broadcast %cst_190 : f32 to vector<32x1xf32>
    %231 = arith.mulf %229, %230 : vector<32x1xf32>
    %c0_191 = arith.constant 0 : index
    %c0_192 = arith.constant 0 : index
    %232 = vector.load %arg4[%c0_191, %c0_192] : memref<4x32xf32, #tpu.memory_space<vmem>>, vector<4x32xf32>
    %cst_193 = arith.constant dense<0.000000e+00> : vector<4x1xf32>
    %233 = tpu.matmul %232, %231, %cst_193 {dimension_numbers = #tpu.dot_dimension_numbers<[1], [0], [0], [1], [0, 0, 1, 1], [], []>} : vector<4x32xf32>, vector<32x1xf32>, vector<4x1xf32> -> vector<4x1xf32>
    %cst_194 = arith.constant 0.000000e+00 : f32
    %234 = vector.broadcast %cst_194 : f32 to vector<4x1xf32>
    %235 = arith.maximumf %233, %234 : vector<4x1xf32>
    %c0_195 = arith.constant 0 : index
    %c0_196 = arith.constant 0 : index
    %236 = vector.load %arg5[%c0_195, %c0_196] : memref<32x4xf32, #tpu.memory_space<vmem>>, vector<32x4xf32>
    %cst_197 = arith.constant dense<0.000000e+00> : vector<32x1xf32>
    %237 = tpu.matmul %236, %235, %cst_197 {dimension_numbers = #tpu.dot_dimension_numbers<[1], [0], [0], [1], [0, 0, 1, 1], [], []>} : vector<32x4xf32>, vector<4x1xf32>, vector<32x1xf32> -> vector<32x1xf32>
    %cst_198 = arith.constant -3.000000e+01 : f32
    %cst_199 = arith.constant 3.000000e+01 : f32
    %238 = vector.broadcast %cst_198 : f32 to vector<32x1xf32>
    %239 = arith.maximumf %238, %237 : vector<32x1xf32>
    %240 = vector.broadcast %cst_199 : f32 to vector<32x1xf32>
    %241 = arith.minimumf %240, %239 : vector<32x1xf32>
    %cst_200 = arith.constant 0.000000e+00 : f32
    %242 = vector.broadcast %cst_200 : f32 to vector<32x1xf32>
    %243 = arith.subf %242, %241 : vector<32x1xf32>
    %244 = math.exp %243 : vector<32x1xf32>
    %cst_201 = arith.constant 1.000000e+00 : f32
    %245 = vector.broadcast %cst_201 : f32 to vector<32x1xf32>
    %246 = arith.addf %245, %244 : vector<32x1xf32>
    %cst_202 = arith.constant 1.000000e+00 : f32
    %247 = vector.broadcast %cst_202 : f32 to vector<32x1xf32>
    %248 = arith.divf %247, %246 : vector<32x1xf32>
    %c0_203 = arith.constant 0 : index
    %c128_204 = arith.constant 128 : index
    %249 = vector.load %arg7[%c0_203, %c128_204] : memref<32x512xf32, #tpu.memory_space<vmem>>, vector<32x256xf32>
    %250 = vector.broadcast %248 : vector<32x1xf32> to vector<32x256xf32>
    %251 = arith.mulf %227, %250 : vector<32x256xf32>
    %252 = arith.addf %251, %249 : vector<32x256xf32>
    %c0_205 = arith.constant 0 : index
    %c0_206 = arith.constant 0 : index
    %c0_207 = arith.constant 0 : index
    %253 = vector.load %arg6[%c0_205, %c0_206, %c0_207] : memref<1x32x256xf32, #tpu.memory_space<vmem>>, vector<1x32x256xf32>
    %254 = vector.shape_cast %253 : vector<1x32x256xf32> to vector<32x256xf32>
    %255 = vector.shape_cast %252 : vector<32x256xf32> to vector<1x32x256xf32>
    tpu.vector_store %arg6[%c0_205, %c0_206, %c0_207], %255 {strides = array<i32>} : memref<1x32x256xf32, #tpu.memory_space<vmem>>, vector<1x32x256xf32>,
    return
  }
  func.func @transform_0(%arg0: i32) -> (i32, i32, i32) {
    %c0_i32 = arith.constant 0 : i32
    %c0_i32_0 = arith.constant 0 : i32
    %c0_i32_1 = arith.constant 0 : i32
    return %arg0, %c0_i32, %c0_i32_0 : i32, i32, i32
  }
  func.func @transform_1(%arg0: i32) -> (i32, i32) {
    %c0_i32 = arith.constant 0 : i32
    %c0_i32_0 = arith.constant 0 : i32
    %c0_i32_1 = arith.constant 0 : i32
    return %c0_i32, %c0_i32_0 : i32, i32
  }
  func.func @transform_2(%arg0: i32) -> (i32, i32) {
    %c0_i32 = arith.constant 0 : i32
    %c0_i32_0 = arith.constant 0 : i32
    %c0_i32_1 = arith.constant 0 : i32
    return %c0_i32, %c0_i32_0 : i32, i32
  }
  func.func @transform_3(%arg0: i32) -> (i32, i32) {
    %c0_i32 = arith.constant 0 : i32
    %c0_i32_0 = arith.constant 0 : i32
    %c0_i32_1 = arith.constant 0 : i32
    return %c0_i32, %c0_i32_0 : i32, i32
  }
  func.func @transform_4(%arg0: i32) -> (i32, i32) {
    %c0_i32 = arith.constant 0 : i32
    %c0_i32_0 = arith.constant 0 : i32
    %c0_i32_1 = arith.constant 0 : i32
    return %c0_i32, %c0_i32_0 : i32, i32
  }
  func.func @transform_5(%arg0: i32) -> (i32, i32, i32) {
    %c0_i32 = arith.constant 0 : i32
    %c0_i32_0 = arith.constant 0 : i32
    %c0_i32_1 = arith.constant 0 : i32
    return %arg0, %c0_i32, %c0_i32_0 : i32, i32, i32
  }
}

</mosaic_0001>

<bundles_post_ra>
// kernel: tpu_custom_call.1
= control target key start
LH: loop header
LB: loop body
LE: loop exit
PB: predicated region body
PF: predicated region fallthrough
CT: control target
= control target key end

     0   :  { %10 = vsyncpa [#allocation7], 0  ;;  %s5621_s0 = inlined_call_operand.hbm [shape: f32[2,32,256], index: 0, kind: input, shape index: {}]   ;;  %s5622_s1 = inlined_call_operand.hbm [shape: f32[32,288], index: 1, kind: input, shape index: {}]   ;;  %s5623_s2 = inlined_call_operand.hbm [shape: f32[32,288], index: 2, kind: input, shape index: {}]   ;;  %s5624_s3 = inlined_call_operand.vmem [shape: f32[4,32], index: 3, kind: input, shape index: {}]   ;;  %s5625_s4 = inlined_call_operand.vmem [shape: f32[32,4], index: 4, kind: input, shape index: {}]   ;;  %s5626_s5 = inlined_call_operand.hbm [shape: f32[2,32,256], index: 5, kind: output, shape index: {}]  }
   0x1   :  { %12 = vsyncpa [#allocation7 + $0x1], 0 }
   0x2   :  { %13 = vsyncpa [#allocation10], 0 }
   0x3   :  { %14 = vsyncpa [#allocation8], 0 }
   0x4   :  { %16 = vsyncpa [#allocation8 + $0x1], 0  ;;  %s4210_s18 = smov 0   ;;  %s4212_s19 = smov 0  }
   0x5   :  { %s4214_s20 = smov 0   ;;  %s4216_s21 = smov 0  }
   0x6 LB: > { %s4231_s22 = sadd.s32 4294967295, %s4157_s21   ;;  %s3270_s23 = sadd.s32 4294967294, %s4157_s21   ;;  %s4157_s21 = sphi %s4216_s21, %s5717_s21   ;;  %s4153_s20 = sphi %s4214_s20, %s5716_s20   ;;  %s4149_s19 = sphi %s4212_s19, %s5715_s19   ;;  %s4145_s18 = sphi %s4210_s18, %s5714_s18  }
   0x7   : > { %p42_p0 = scmp.ne.s32.totalorder %s4149_s19, %s4145_s18  ;;  %p5627_p1 = scmp.eq.s32.totalorder %s4231_s22, 0 }
   0x8   : > { %p156_p3 = scmp.eq.s32.totalorder %s3270_s23, 1  ;;  %p3271_p5 = scmp.ge.s32.totalorder %s4157_s21, 1 }
   0x9   : > { %p4240_p4 = por %p5627_p1, %p42_p0  ;;  %p163_p7 = scmp.lt.s32.totalorder %s4157_s21, 3 }
   0xa   : > { %p4245_p6 = por %p156_p3, %p42_p0  ;;  %s4159_s27 = smov [#allocation9]  }
   0xb   : > { %s5646_s24 = scalar_select %p4240_p4, 1, 0 }
   0xc   : > { %s5647_s25 = scalar_select %p4245_p6, 1, 0 }
   0xd   : > { %p4250_p8 = pnand %p3271_p5, %p163_p7  ;;  %s175_s28 = sshll.u32 %s4159_s27, 4  ;;  %s176_s28 = int_to_ptr.vmem [resolvable:$true] %s175_s28 }
   0xe   : > { %s4160_s30 = smov [#allocation11]   ;;  %s4020_s7 = scalar_lea.vmem %s176_s28, 1536 }
   0xf   : > { %s5648_s26 = scalar_select %p4250_p8, 1, 0 }
  0x10   : > { %p3761_p9 = pneg %p4250_p8  ;;  %s188_s6 = sshll.u32 %s4160_s30, 4  ;;  %s189_s6 = int_to_ptr.vmem [resolvable:$true] %s188_s6 }
  0x11   : > { %p4021_p13 = scmp.ne.s32.totalorder %s176_s28, %s4020_s7  ;;  %p4028_p5 = scmp.lt.s32.totalorder %s176_s28, %s176_s28 }
  0x12   : > { %p4259_p11 = pnand %p3761_p9, %p5627_p1  ;;  %p4029_p7 = scmp.lt.s32.totalorder %s4020_s7, %s4020_s7 }
  0x14   : > { %p4011_p12 = pneg %p4259_p11  ;;  %p4030_p10 = por %p4029_p7, %p4028_p5 }
  0x16   : > { %p4023_p0 = pnand %p4021_p13, %p4011_p12 }
  0x18   : > { %p4024_p3 = pneg %p4023_p0 }
  0x1a   : > { %p4031_p9 = pnand %p4030_p10, %p4024_p3 }
  0x1c   : > { %4034 = shalt.err (!%p4031_p9)
}
  0x1d   : > { %s4161_s8 = smov 384   ;;  %s4162_s9 = smov 24  }
  0x1e   : > { %3764 = dma.hbm_to_vmem [thread:$0]  (!%p4259_p11), %s5622_s1, 1536, %s176_s28, [#allocation10], %s4161_s8, %s4161_s8, %s4162_s9  }
  0x1f   : > { %s4046_s12 = scalar_lea.vmem %s189_s6, 1536  ;;  %p4054_p2 = scmp.lt.s32.totalorder %s189_s6, %s189_s6 }
  0x20   : > { %p4047_p1 = scmp.ne.s32.totalorder %s189_s6, %s4046_s12  ;;  %p4055_p6 = scmp.lt.s32.totalorder %s4046_s12, %s4046_s12 }
  0x22   : > { %p4049_p13 = pnand %p4047_p1, %p4011_p12  ;;  %p4056_p5 = por %p4055_p6, %p4054_p2 }
  0x24   : > { %p4050_p0 = pneg %p4049_p13 }
  0x26   : > { %p4057_p10 = pnand %p4056_p5, %p4050_p0 }
  0x28   : > { %4060 = shalt.err (!%p4057_p10)
}
  0x29   : > { %3767 = dma.hbm_to_vmem [thread:$0]  (!%p4259_p11), %s5623_s2, 1536, %s189_s6, [#allocation10], %s4161_s8, %s4161_s8, %s4162_s9  }
  0x2a   : > { %s4282_s15 = sadd.s32 1, %s4157_s21   ;;  %s29_s16 = sadd.s32 1, %s4153_s20 }
  0x2b   : > { %s26_s17 = ssub.s32 %s4157_s21, %s4282_s15  ;;  %p36_p1 = scmp.ne.s32.totalorder %s4153_s20, %s4149_s19 }
  0x2c   : > { %p27_p2 = scmp.eq.s32.totalorder %s26_s17, 0  ;;  %p37_p6 = scmp.eq.s32.totalorder %s4157_s21, 0 }
  0x2d   : > { %p5650_p12 = scmp.eq.s32.totalorder %s4231_s22, 1  ;;  %p3778_p7 = scmp.lt.s32.totalorder %s4157_s21, 2 }
  0x2e   : > { %s4298_s27 = scalar_select %p27_p2, %s4153_s20, %s29_s16  }
  0x2f   : > { %p4292_p3 = por %p5650_p12, %p36_p1  ;;  %p38_p9 = por %p37_p6, %p36_p1 }
  0x30   : > { %s208_s28 = sand.u32 1, %s4153_s20   ;;  %s3314_s30 = sshll.u32 %s4157_s21, 10 }
  0x31   : > { %s5651_s23 = scalar_select %p4292_p3, 1, 0 }
  0x32   : > { %s3275_s29 = sshll.u32 %s208_s28, 6  ;;  %s4305_s8 = scalar_lea.hbm %s5621_s0, %s3314_s30 }
  0x33   : > { %s212_s9 = scalar_lea.vmem [#allocation6], %s3275_s29  ;;  %p4309_p11 = pnand %p3778_p7, %p38_p9 }
  0x34   : > { %s219_s10 = sshll.u32 %s212_s9, 4  ;;  %s4313_s12 = scalar_lea.sflag [#allocation7], %s208_s28  ;;  %s4307_s10 = int_to_ptr.vmem [resolvable:$true] %s219_s10 }
  0x35   : > { %s4061_s13 = scalar_lea.hbm %s4305_s8, 1024  ;;  %p4063_p0 = pneg %p4309_p11 }
  0x36   : > { %p4062_p13 = scmp.ne.s32.totalorder %s4305_s8, %s4061_s13  ;;  %s4066_s17 = scalar_lea.hbm %s5621_s0, 2048 }
  0x37   : > { %p4067_p1 = scmp.lt.s32.totalorder %s4305_s8, %s5621_s0  ;;  %p4068_p2 = scmp.lt.s32.totalorder %s4066_s17, %s4061_s13 }
  0x38   : > { %p4064_p5 = pnand %p4063_p0, %p4062_p13 }
  0x39   : > { %p4069_p6 = por %p4068_p2, %p4067_p1 }
  0x3a   : > { %p4065_p10 = pneg %p4064_p5 }
  0x3c   : > { %p4070_p12 = pnand %p4069_p6, %p4065_p10 }
  0x3e   : > { %4073 = shalt.err (!%p4070_p12)
}
  0x3f   : > { %s4074_s28 = scalar_lea.vmem %s4307_s10, 1024  ;;  %s4163_s6 = smov [#allocation6]  }
  0x40   : > { %p4075_p7 = scmp.ne.s32.totalorder %s4307_s10, %s4074_s28  ;;  %s4079_s7 = sshll.u32 %s4163_s6, 4  ;;  %s4080_s7 = int_to_ptr.vmem [resolvable:$false] %s4079_s7 }
  0x41   : > { %s4081_s9 = scalar_lea.vmem %s4080_s7, 2048  ;;  %p4082_p5 = scmp.lt.s32.totalorder %s4307_s10, %s4080_s7 }
  0x42   : > { %p4077_p9 = pnand %p4075_p7, %p4063_p0  ;;  %p4083_p3 = scmp.lt.s32.totalorder %s4081_s9, %s4074_s28 }
  0x44   : > { %p4078_p13 = pneg %p4077_p9  ;;  %p4084_p4 = por %p4083_p3, %p4082_p5 }
  0x46   : > { %p4085_p8 = pnand %p4084_p4, %p4078_p13 }
  0x48   : > { %4088 = shalt.err (!%p4085_p8)
}
  0x49   : > { %s4164_s13 = smov 256   ;;  %s4165_s14 = smov 16  }
  0x4a   : > { %3771 = dma.hbm_to_vmem [thread:$0]  (!%p4309_p11), %s4305_s8, 1024, %s4307_s10, %s4313_s12, %s4164_s13, %s4164_s13, %s4165_s14  }
  0x4b   : > { %p5653_p0 = scmp.ne.s32.totalorder %s5648_s26, 0 }
  0x4d   : > { %231 = sbr.rel (%p5653_p0) target bundleno = 1933 (0x78d), region = 40 }
  0x52   : > { %s4337_s16 = sand.u32 1, %s4149_s19   ;;  %p5654_p4 = scmp.ne.s32.totalorder %s5646_s24, 0 }
  0x53   : > { %s3279_s17 = sshll.u32 %s4337_s16, 6  ;;  %s234_s29 = scalar_lea.sflag [#allocation7], %s4337_s16 }
  0x54   : > { %s4343_s30 = scalar_lea.vmem [#allocation6], %s3279_s17 }
  0x55   : > { %4132 = dma.done.wait (%p5654_p4), %s234_s29, 1024  }
  0x56   : > { %4134 = vsyncadd (%p5654_p4), %s234_s29, 4294966272  ;;  %p5655_p8 = scmp.eq.s32.totalorder %s4231_s22, 0 }
  0x58   : > { %4136 = dma.done.wait (%p5655_p8), [#allocation10], 3072   ;;  %p5656_p3 = pmov %p5655_p8 }
  0x59   : > { %v4354_v0 = vld [vmem:[%s4343_s30 + $0x30] sm:$0xff]  ;;  %v4357_v1 = vld [vmem:[%s4343_s30 + $0x20] sm:$0xff]  ;;  %s4166_s24 = smov 111   ;;  %v4364_v2 = vld [vmem:[%s4343_s30 + $0x38] sm:$0xff]  ;;  %vm753_vm0 = vcmask 261120   ;;  %v5631_v9 = vmov 0.0   ;;  %v304_v10 = vlaneseq }
  0x5a   : > { %4138 = vsyncadd (%p5656_p3), [#allocation10], 4294964224  ;;  %684 = vrot.lane.b32.xlu0 %v4354_v0, %s4166_s24  ;;  %680 = vrot.lane.b32.xlu1 %v4357_v1, %s4166_s24  ;;  %v4367_v3 = vld [vmem:[%s4343_s30 + $0x28] sm:$0xff]  ;;  %v4374_v4 = vld [vmem:[%s4343_s30 + $0x18] sm:$0xff]  ;;  %s4168_s26 = smov 112   ;;  %s4169_s8 = smov 1  }
  0x5b   : > { %v4377_v5 = vld [vmem:[%s4343_s30 + $0x10] sm:$0xff]  ;;  %v4386_v7 = vld [vmem:[%s4343_s30 + $0x8] sm:$0xff]  ;;  %v4389_v8 = vld [vmem:[%s4343_s30] sm:$0xff]  ;;  %s4170_s10 = smov 113   ;;  %s4171_s11 = smov 15   ;;  %v305_v11 = vand.u32 127, %v304_v10 }
  0x5c   : > { %v4379_v6 = vld [vmem:[#allocation9 + $0x10] sm:$0xff]  ;;  %s4172_s12 = smov 127   ;;  %vm688_vm1 = vcmask 908288   ;;  %s4173_s28 = smov 16   ;;  %v4529_v26 = vld [vmem:[#allocation9 + $0x28] sm:$0xff]  ;;  %vm643_vm3 = vcmask 916480  }
  0x5d   : > { %3682 = vmatprep.mubr.msk.f32.mxu1 %vm753_vm0, %v4379_v6  ;;  %v306_v12 = vand.u32 15, %v305_v11  ;;  %vm488_vm4 = vcmask 7168   ;;  %s4174_s6 = smov 17   ;;  %vm594_vm6 = vcmask 924672   ;;  %vm439_vm7 = vcmask 121856   ;;  %p5711_p10 = scmp.ne.s32.totalorder %s5651_s23, 0 }
  0x5e   : > { %686 = vrot.lane.b32.xlu0 %v4364_v2, %s4166_s24  ;;  %682 = vrot.lane.b32.xlu1 %v4367_v3, %s4166_s24  ;;  %vm545_vm8 = vcmask 1039360   ;;  %vm392_vm9 = vcmask 130048   ;;  %vm343_vm10 = vcmask 138240   ;;  %v5710_v31 = vmov 0.0   ;;  %s4178_s29 = smov [#allocation12]  }
  0x5f   : > { %vm4501_vm2 = vcmp.lt.s32.totalorder %v306_v12, 15  ;;  %vm4546_vm5 = vcmp.gt.s32.totalorder %v306_v12, 0  ;;  %v4175_v15 = vmov 1.0   ;;  %vm4176_vm11 = vmmov 0  }
  0x60   : > { %vm2978_vm12 = vcmask 31744   ;;  %vm2991_vm13 = vcmask 1043456  }
  0x62   : > { %678 = vrot.lane.b32.xlu1 %v4374_v4, %s4166_s24  ;;  %676 = vrot.lane.b32.xlu0 %v4377_v5, %s4166_s24 }
  0x66   : > { %674 = vrot.lane.b32.xlu1 %v4386_v7, %s4166_s24  ;;  %672 = vrot.lane.b32.xlu0 %v4389_v8, %s4166_s24 }
  0x6a   : > { %3834 = vrot.lane.b32.xlu1 %v5631_v9, %s4168_s26  ;;  %1264 = vrot.lane.b32.xlu0 %v4364_v2, %s4168_s26 }
  0x6e   : > { %1114 = vrot.lane.b32.xlu1 %v4364_v2, %s4169_s8  ;;  %1112 = vrot.lane.b32.xlu0 %v4354_v0, %s4169_s8 }
  0x72   : > { %1108 = vrot.lane.b32.xlu1 %v4357_v1, %s4169_s8  ;;  %1260 = vrot.lane.b32.xlu0 %v4367_v3, %s4168_s26 }
  0x76   : > { %639 = vrot.lane.b32.xlu1 %v4354_v0, %s4168_s26  ;;  %1110 = vrot.lane.b32.xlu0 %v4367_v3, %s4169_s8 }
  0x7a   : > { %1256 = vrot.lane.b32.xlu1 %v4374_v4, %s4168_s26  ;;  %641 = vrot.lane.b32.xlu0 %v4364_v2, %s4168_s26 }
  0x7e   : > { %3844 = vrot.lane.b32.xlu1 %v5631_v9, %s4169_s8  ;;  %3839 = vrot.lane.b32.xlu0 %v5631_v9, %s4168_s26 }
  0x82   : > { %1104 = vrot.lane.b32.xlu1 %v4377_v5, %s4169_s8  ;;  %486 = vrot.lane.b32.xlu0 %v4354_v0, %s4169_s8 }
  0x86   : > { %635 = vrot.lane.b32.xlu1 %v4357_v1, %s4168_s26  ;;  %1106 = vrot.lane.b32.xlu0 %v4374_v4, %s4169_s8 }
  0x8a   : > { %1252 = vrot.lane.b32.xlu1 %v4386_v7, %s4168_s26  ;;  %637 = vrot.lane.b32.xlu0 %v4367_v3, %s4168_s26 }
  0x8e   : > { %1100 = vrot.lane.b32.xlu1 %v4389_v8, %s4169_s8  ;;  %482 = vrot.lane.b32.xlu0 %v4357_v1, %s4169_s8 }
  0x92   : > { %631 = vrot.lane.b32.xlu1 %v4377_v5, %s4168_s26  ;;  %1102 = vrot.lane.b32.xlu0 %v4386_v7, %s4169_s8 }
  0x96   : > { %1216 = vrot.lane.b32.xlu1 %v4364_v2, %s4170_s10  ;;  %633 = vrot.lane.b32.xlu0 %v4374_v4, %s4168_s26 }
  0x9a   : > { %3854 = vrot.lane.b32.xlu1 %v5631_v9, %s4169_s8  ;;  %3849 = vrot.lane.b32.xlu0 %v5631_v9, %s4170_s10 }
  0x9e   : > { %1064 = vrot.lane.b32.xlu1 %v4354_v0, %s4171_s11  ;;  %478 = vrot.lane.b32.xlu0 %v4377_v5, %s4169_s8 }
  0xa2   : > { %627 = vrot.lane.b32.xlu1 %v4389_v8, %s4168_s26  ;;  %1066 = vrot.lane.b32.xlu0 %v4364_v2, %s4171_s11 }
  0xa6   : > { %1212 = vrot.lane.b32.xlu1 %v4367_v3, %s4170_s10  ;;  %629 = vrot.lane.b32.xlu0 %v4386_v7, %s4168_s26 }
  0xaa   : > { %1060 = vrot.lane.b32.xlu1 %v4357_v1, %s4171_s11  ;;  %474 = vrot.lane.b32.xlu0 %v4389_v8, %s4169_s8 }
  0xae   : > { %590 = vrot.lane.b32.xlu1 %v4354_v0, %s4170_s10  ;;  %1062 = vrot.lane.b32.xlu0 %v4367_v3, %s4171_s11 }
  0xb2   : > { %1208 = vrot.lane.b32.xlu1 %v4374_v4, %s4170_s10  ;;  %592 = vrot.lane.b32.xlu0 %v4364_v2, %s4170_s10 }
  0xb6   : > { %3864 = vrot.lane.b32.xlu1 %v5631_v9, %s4171_s11  ;;  %3859 = vrot.lane.b32.xlu0 %v5631_v9, %s4170_s10 }
  0xba   : > { %1056 = vrot.lane.b32.xlu1 %v4377_v5, %s4171_s11  ;;  %437 = vrot.lane.b32.xlu0 %v4354_v0, %s4171_s11 }
  0xbe   : > { %586 = vrot.lane.b32.xlu1 %v4357_v1, %s4170_s10  ;;  %1058 = vrot.lane.b32.xlu0 %v4374_v4, %s4171_s11 }
  0xc2   : > { %1204 = vrot.lane.b32.xlu1 %v4386_v7, %s4170_s10  ;;  %588 = vrot.lane.b32.xlu0 %v4367_v3, %s4170_s10 }
  0xc6   : > { %1052 = vrot.lane.b32.xlu1 %v4389_v8, %s4171_s11  ;;  %433 = vrot.lane.b32.xlu0 %v4357_v1, %s4171_s11 }
  0xca   : > { %582 = vrot.lane.b32.xlu1 %v4377_v5, %s4170_s10  ;;  %1054 = vrot.lane.b32.xlu0 %v4386_v7, %s4171_s11 }
  0xcc   : > { %v685_v13 = vpop.permute.xlu0 %684  ;;  %v681_v14 = vpop.permute.xlu1 %680 }
  0xce   : > { %1168 = vrot.lane.b32.xlu1 %v4364_v2, %s4172_s12  ;;  %584 = vrot.lane.b32.xlu0 %v4374_v4, %s4170_s10 }
  0xd0   : > { %v687_v16 = vpop.permute.xlu0 %686  ;;  %v683_v17 = vpop.permute.xlu1 %682 }
  0xd1   : > { %v692_v18 = vsel %vm688_vm1, %v685_v13, %v687_v16  ;;  %v691_v19 = vsel %vm688_vm1, %v681_v14, %v683_v17 }
  0xd2   : > { %3674 = vmatprep.subr.msk.mxu1 %vm4501_vm2, %v692_v18  ;;  %3874 = vrot.lane.b32.xlu1 %v5631_v9, %s4171_s11 }
  0xd3   : > { %3869 = vrot.lane.b32.xlu0 %v5631_v9, %s4172_s12  ;;  %3675 = vmatpush3.msk.msra.mxu1 %vm4501_vm2, %v692_v18 }
  0xd4   : > { %3676 = vmatprep.subr.msk.mxu1 %vm4501_vm2, %v691_v19  ;;  %v679_v20 = vpop.permute.xlu1 %678  ;;  %v677_v21 = vpop.permute.xlu0 %676 }
  0xd5   : > { %v690_v22 = vsel %vm688_vm1, %v677_v21, %v679_v20  ;;  %3677 = vmatpush3.msk.msra.mxu1 %vm4501_vm2, %v691_v19 }
  0xd6   : > { %3678 = vmatprep.subr.msk.mxu1 %vm4501_vm2, %v690_v22  ;;  %1020 = vrot.lane.b32.xlu1 %v4354_v0, %s4173_s28 }
  0xd7   : > { %429 = vrot.lane.b32.xlu0 %v4377_v5, %s4171_s11  ;;  %3679 = vmatpush3.msk.msra.mxu1 %vm4501_vm2, %v690_v22 }
  0xd8   : > { %v675_v23 = vpop.permute.xlu1 %674  ;;  %v673_v24 = vpop.permute.xlu0 %672 }
  0xd9   : > { %v689_v25 = vsel %vm688_vm1, %v673_v24, %v675_v23 }
  0xda   : > { %578 = vrot.lane.b32.xlu1 %v4389_v8, %s4170_s10  ;;  %3680 = vmatprep.subr.msk.mxu1 %vm4501_vm2, %v689_v25 }
  0xdb   : > { %1022 = vrot.lane.b32.xlu0 %v4364_v2, %s4173_s28  ;;  %3681 = vmatpush3.msk.msra.mxu1 %vm4501_vm2, %v689_v25 }
  0xdc   : > { %v3835_v27 = vpop.permute.xlu1 %3834  ;;  %v1265_v28 = vpop.permute.xlu0 %1264  ;;  %3683 = vmatmul.mubr.msk.f32.vlgmr.msra.gmra.mxu1 %vm753_vm0, %v4529_v26 }
  0xdd   : > { %v3836_v29 = vunpack.i.l.bf16 %v3835_v27  ;;  %v3837_v35 = vunpack.i.h.bf16 %v3835_v27 }
  0xde   : > { %1164 = vrot.lane.b32.xlu1 %v4367_v3, %s4172_s12 }
  0xdf   : > { %580 = vrot.lane.b32.xlu0 %v4386_v7, %s4170_s10  ;;  %v1271_v30 = vsel %vm643_vm3, %v1265_v28, %v3836_v29 }
  0xe0   : > { %v1115_v32 = vpop.permute.xlu1 %1114  ;;  %3464 = vmatprep.subr.mxu1 %v1271_v30  ;;  %v1113_v33 = vpop.permute.xlu0 %1112 }
  0xe1   : > { %v1119_v34 = vsel %vm488_vm4, %v1113_v33, %v1115_v32 }
  0xe2   : > { %1016 = vrot.lane.b32.xlu1 %v4357_v1, %s4173_s28  ;;  %3465 = vmatpush3.msk.msra.mxu1 %vm4546_vm5, %v1119_v34 }
  0xe3   : > { %425 = vrot.lane.b32.xlu0 %v4389_v8, %s4171_s11 }
  0xe4   : > { %v1109_v36 = vpop.permute.xlu1 %1108  ;;  %v1261_v37 = vpop.permute.xlu0 %1260 }
  0xe5   : > { %v1270_v38 = vsel %vm643_vm3, %v1261_v37, %v3837_v35 }
  0xe6   : > { %541 = vrot.lane.b32.xlu1 %v4354_v0, %s4172_s12  ;;  %3466 = vmatprep.subr.mxu1 %v1270_v38 }
  0xe7   : > { %1018 = vrot.lane.b32.xlu0 %v4367_v3, %s4173_s28 }
  0xe8   : > { %v640_v39 = vpop.permute.xlu1 %639  ;;  %v1111_v40 = vpop.permute.xlu0 %1110 }
  0xe9   : > { %v1118_v41 = vsel %vm488_vm4, %v1109_v36, %v1111_v40 }
  0xea   : > { %1160 = vrot.lane.b32.xlu1 %v4374_v4, %s4172_s12  ;;  %3467 = vmatpush3.msk.msra.mxu1 %vm4546_vm5, %v1118_v41 }
  0xeb   : > { %543 = vrot.lane.b32.xlu0 %v4364_v2, %s4172_s12 }
  0xec   : > { %v1257_v42 = vpop.permute.xlu1 %1256  ;;  %v642_v43 = vpop.permute.xlu0 %641 }
  0xed   : > { %v647_v44 = vsel %vm643_vm3, %v640_v39, %v642_v43 }
  0xee   : > { %3884 = vrot.lane.b32.xlu1 %v5631_v9, %s4173_s28  ;;  %3412 = vmatprep.subr.mxu0 %v647_v44 }
  0xef   : > { %3879 = vrot.lane.b32.xlu0 %v5631_v9, %s4172_s12 }
  0xf0   : > { %v3845_v45 = vpop.permute.xlu1 %3844  ;;  %v3840_v46 = vpop.permute.xlu0 %3839 }
  0xf1   : > { %v3846_v47 = vunpack.i.l.bf16 %v3845_v45  ;;  %v3841_v48 = vunpack.i.l.bf16 %v3840_v46  ;;  %v3842_v56 = vunpack.i.h.bf16 %v3840_v46  ;;  %v3847_v61 = vunpack.i.h.bf16 %v3845_v45 }
  0xf2   : > { %1012 = vrot.lane.b32.xlu1 %v4377_v5, %s4173_s28 }
  0xf3   : > { %390 = vrot.lane.b32.xlu0 %v4354_v0, %s4173_s28  ;;  %v1269_v49 = vsel %vm643_vm3, %v1257_v42, %v3841_v48  ;;  %v706_v42 = vld [vmem:[#allocation9 + $0x8] sm:$0xff] }
  0xf4   : > { %v1105_v50 = vpop.permute.xlu1 %1104  ;;  %v487_v51 = vpop.permute.xlu0 %486  ;;  %3468 = vmatprep.subr.mxu1 %v1269_v49  ;;  %830 = vmatprep.mubr.f32.mxu0 %v706_v42 }
  0xf5   : > { %v492_v52 = vsel %vm488_vm4, %v3846_v47, %v487_v51 }
  0xf6   : > { %537 = vrot.lane.b32.xlu1 %v4357_v1, %s4172_s12  ;;  %3413 = vmatpush3.msk.msra.mxu0 %vm4546_vm5, %v492_v52 }
  0xf7   : > { %1014 = vrot.lane.b32.xlu0 %v4374_v4, %s4173_s28 }
  0xf8   : > { %v636_v53 = vpop.permute.xlu1 %635  ;;  %v1107_v54 = vpop.permute.xlu0 %1106 }
  0xf9   : > { %v1117_v55 = vsel %vm488_vm4, %v1105_v50, %v1107_v54 }
  0xfa   : > { %1156 = vrot.lane.b32.xlu1 %v4386_v7, %s4172_s12  ;;  %3469 = vmatpush3.msk.msra.mxu1 %vm4546_vm5, %v1117_v55  ;;  %v4680_v55 = vld [vmem:[#allocation9 + $0x40] sm:$0xff] }
  0xfb   : > { %539 = vrot.lane.b32.xlu0 %v4367_v3, %s4172_s12  ;;  %3685 = vmatprep.mubr.msk.f32.mxu1 %vm753_vm0, %v4680_v55 }
  0xfc   : > { %v1253_v57 = vpop.permute.xlu1 %1252  ;;  %v638_v58 = vpop.permute.xlu0 %637 }
  0xfd   : > { %v646_v59 = vsel %vm643_vm3, %v636_v53, %v638_v58  ;;  %v1268_v60 = vsel %vm643_vm3, %v1253_v57, %v3842_v56  ;;  %v4682_v56 = vld [vmem:[#allocation9 + $0x58] sm:$0xff] }
  0xfe   : > { %1008 = vrot.lane.b32.xlu1 %v4389_v8, %s4173_s28  ;;  %3414 = vmatprep.subr.mxu0 %v646_v59 }
  0xff   : > { %386 = vrot.lane.b32.xlu0 %v4357_v1, %s4173_s28  ;;  %3470 = vmatprep.subr.mxu1 %v1268_v60 }
 0x100   : > { %v1101_v62 = vpop.permute.xlu1 %1100  ;;  %v483_v63 = vpop.permute.xlu0 %482  ;;  %3686 = vmatmul.mubr.msk.f32.gmra.mxu1 %vm753_vm0, %v4682_v56 }
 0x101   : > { %v491_v10 = vsel %vm488_vm4, %v3847_v61, %v483_v63  ;;  %1452 = vmatprep.mubr.f32.mxu1 %v706_v42 }
 0x102   : > { %533 = vrot.lane.b32.xlu1 %v4377_v5, %s4172_s12  ;;  %3415 = vmatpush3.msk.msra.mxu0 %vm4546_vm5, %v491_v10 }
 0x103   : > { %1010 = vrot.lane.b32.xlu0 %v4386_v7, %s4173_s28 }
 0x104   : > { %v632_v11 = vpop.permute.xlu1 %631  ;;  %v1103_v12 = vpop.permute.xlu0 %1102 }
 0x105   : > { %v1116_v13 = vsel %vm488_vm4, %v1101_v62, %v1103_v12 }
 0x106   : > { %3889 = vrot.lane.b32.xlu1 %v5631_v9, %s4173_s28  ;;  %3471 = vmatpush3.msk.msra.mxu1 %vm4546_vm5, %v1116_v13 }
 0x107   : > { %535 = vrot.lane.b32.xlu0 %v4374_v4, %s4172_s12 }
 0x108   : > { %v1217_v14 = vpop.permute.xlu1 %1216  ;;  %v634_v16 = vpop.permute.xlu0 %633 }
 0x109   : > { %v645_v17 = vsel %vm643_vm3, %v632_v11, %v634_v16 }
 0x10a   : > { %972 = vrot.lane.b32.xlu1 %v4354_v0, %s4174_s6  ;;  %3416 = vmatprep.subr.mxu0 %v645_v17 }
 0x10b   : > { %382 = vrot.lane.b32.xlu0 %v4377_v5, %s4173_s28 }
 0x10c   : > { %v3855_v18 = vpop.permute.xlu1 %3854  ;;  %v3850_v19 = vpop.permute.xlu0 %3849 }
 0x10d   : > { %v3856_v20 = vunpack.i.l.bf16 %v3855_v18  ;;  %v3851_v21 = vunpack.i.l.bf16 %v3850_v19  ;;  %v3852_v30 = vunpack.i.h.bf16 %v3850_v19  ;;  %v3857_v36 = vunpack.i.h.bf16 %v3855_v18 }
 0x10e   : > { %529 = vrot.lane.b32.xlu1 %v4389_v8, %s4172_s12 }
 0x10f   : > { %974 = vrot.lane.b32.xlu0 %v4364_v2, %s4174_s6  ;;  %v1223_v22 = vsel %vm594_vm6, %v1217_v14, %v3851_v21 }
 0x110   : > { %v1065_v23 = vpop.permute.xlu1 %1064  ;;  %v479_v24 = vpop.permute.xlu0 %478  ;;  %3472 = vmatprep.subr.msk.mxu1 %vm4546_vm5, %v1223_v22 }
 0x111   : > { %v490_v25 = vsel %vm488_vm4, %v3856_v20, %v479_v24 }
 0x112   : > { %378 = vrot.lane.b32.xlu1 %v4389_v8, %s4173_s28  ;;  %3417 = vmatpush3.msk.msra.mxu0 %vm4546_vm5, %v490_v25 }
 0x113   : > { %531 = vrot.lane.b32.xlu0 %v4386_v7, %s4172_s12 }
 0x114   : > { %v628_v27 = vpop.permute.xlu1 %627  ;;  %v1067_v28 = vpop.permute.xlu0 %1066 }
 0x115   : > { %v1071_v29 = vsel %vm439_vm7, %v1065_v23, %v1067_v28 }
 0x116   : > { %970 = vrot.lane.b32.xlu1 %v4367_v3, %s4174_s6  ;;  %3473 = vmatpush3.msk.msra.mxu1 %vm4501_vm2, %v1071_v29 }
 0x117   : > { %968 = vrot.lane.b32.xlu0 %v4357_v1, %s4174_s6 }
 0x118   : > { %v1213_v32 = vpop.permute.xlu1 %1212  ;;  %v630_v33 = vpop.permute.xlu0 %629 }
 0x119   : > { %v1222_v34 = vsel %vm594_vm6, %v1213_v32, %v3852_v30  ;;  %v644_v35 = vsel %vm643_vm3, %v628_v27, %v630_v33 }
 0x11a   : > { %341 = vrot.lane.b32.xlu1 %v4354_v0, %s4174_s6  ;;  %3418 = vmatprep.subr.mxu0 %v644_v35 }
 0x11b   : > { %3894 = vrot.lane.b32.xlu0 %v5631_v9, %s4174_s6  ;;  %3474 = vmatprep.subr.msk.mxu1 %vm4546_vm5, %v1222_v34 }
 0x11c   : > { %v1061_v37 = vpop.permute.xlu1 %1060  ;;  %v475_v38 = vpop.permute.xlu0 %474 }
 0x11d   : > { %v489_v39 = vsel %vm488_vm4, %v3857_v36, %v475_v38 }
 0x11e   : > { %966 = vrot.lane.b32.xlu1 %v4374_v4, %s4174_s6  ;;  %3419 = vmatpush3.msk.msra.mxu0 %vm4546_vm5, %v489_v39 }
 0x11f   : > { %964 = vrot.lane.b32.xlu0 %v4377_v5, %s4174_s6 }
 0x120   : > { %v591_v40 = vpop.permute.xlu1 %590  ;;  %v1063_v41 = vpop.permute.xlu0 %1062 }
 0x121   : > { %v1070_v43 = vsel %vm439_vm7, %v1061_v37, %v1063_v41 }
 0x122   : > { %960 = vrot.lane.b32.xlu1 %v4389_v8, %s4174_s6  ;;  %3475 = vmatpush3.msk.msra.mxu1 %vm4501_vm2, %v1070_v43 }
 0x123   : > { %337 = vrot.lane.b32.xlu0 %v4357_v1, %s4174_s6 }
 0x124   : > { %v1209_v44 = vpop.permute.xlu1 %1208  ;;  %v593_v45 = vpop.permute.xlu0 %592 }
 0x125   : > { %v598_v46 = vsel %vm594_vm6, %v591_v40, %v593_v45 }
 0x126   : > { %3899 = vrot.lane.b32.xlu1 %v5631_v9, %s4174_s6  ;;  %3420 = vmatprep.subr.msk.mxu0 %vm4546_vm5, %v598_v46 }
 0x127   : > { %962 = vrot.lane.b32.xlu0 %v4386_v7, %s4174_s6 }
 0x128   : > { %v3865_v47 = vpop.permute.xlu1 %3864  ;;  %v3860_v48 = vpop.permute.xlu0 %3859 }
 0x129   : > { %v3866_v49 = vunpack.i.l.bf16 %v3865_v47  ;;  %v3861_v50 = vunpack.i.l.bf16 %v3860_v48  ;;  %v3862_v60 = vunpack.i.h.bf16 %v3860_v48  ;;  %v3867_v11 = vunpack.i.h.bf16 %v3865_v47 }
 0x12a   : > { %329 = vrot.lane.b32.xlu1 %v4389_v8, %s4174_s6 }
 0x12b   : > { %333 = vrot.lane.b32.xlu0 %v4377_v5, %s4174_s6  ;;  %v1221_v51 = vsel %vm594_vm6, %v1209_v44, %v3861_v50 }
 0x12c   : > { %v1057_v52 = vpop.permute.xlu1 %1056  ;;  %v438_v53 = vpop.permute.xlu0 %437  ;;  %3476 = vmatprep.subr.msk.mxu1 %vm4546_vm5, %v1221_v51 }
 0x12d   : > { %v443_v54 = vsel %vm439_vm7, %v3866_v49, %v438_v53 }
 0x12e   : > { %3421 = vmatpush3.msk.msra.mxu0 %vm4501_vm2, %v443_v54  ;;  %3904 = vrot.lane.b32.xlu1 %v5631_v9, %s4166_s24 }
 0x12f   : > { %1308 = vrot.lane.b32.xlu0 %v4364_v2, %s4166_s24 }
 0x130   : > { %v587_v57 = vpop.permute.xlu1 %586  ;;  %v1059_v58 = vpop.permute.xlu0 %1058 }
 0x131   : > { %v1069_v59 = vsel %vm439_vm7, %v1057_v52, %v1059_v58 }
 0x132   : > { %3477 = vmatpush3.msk.msra.mxu1 %vm4501_vm2, %v1069_v59  ;;  %1300 = vrot.lane.b32.xlu1 %v4374_v4, %s4166_s24 }
 0x133   : > { %1304 = vrot.lane.b32.xlu0 %v4367_v3, %s4166_s24 }
 0x134   : > { %v1205_v61 = vpop.permute.xlu1 %1204  ;;  %v589_v62 = vpop.permute.xlu0 %588 }
 0x135   : > { %v1220_v63 = vsel %vm594_vm6, %v1205_v61, %v3862_v60  ;;  %v597_v10 = vsel %vm594_vm6, %v587_v57, %v589_v62 }
 0x136   : > { %3422 = vmatprep.subr.msk.mxu0 %vm4546_vm5, %v597_v10  ;;  %3478 = vmatprep.subr.msk.mxu1 %vm4546_vm5, %v1220_v63 }
 0x137   : > { %1302 = vrot.lane.b32.xlu0 %v5631_v9, %s4166_s24  ;;  %1296 = vrot.lane.b32.xlu1 %v4386_v7, %s4166_s24 }
 0x138   : > { %v1053_v12 = vpop.permute.xlu1 %1052  ;;  %v434_v13 = vpop.permute.xlu0 %433 }
 0x139   : > { %v442_v14 = vsel %vm439_vm7, %v3867_v11, %v434_v13 }
 0x13a   : > { %3423 = vmatpush3.msk.msra.mxu0 %vm4501_vm2, %v442_v14 }
 0x13b   : > { %1298 = vrot.lane.b32.xlu0 %v5631_v9, %s4166_s24  ;;  %3909 = vrot.lane.b32.xlu1 %v5631_v9, %s4169_s8 }
 0x13c   : > { %v583_v16 = vpop.permute.xlu1 %582  ;;  %v1055_v17 = vpop.permute.xlu0 %1054 }
 0x13d   : > { %v1068_v18 = vsel %vm439_vm7, %v1053_v12, %v1055_v17 }
 0x13e   : > { %3479 = vmatpush3.msk.msra.mxu1 %vm4501_vm2, %v1068_v18 }
 0x13f   : > { %3914 = vrot.lane.b32.xlu0 %v5631_v9, %s4169_s8  ;;  %3919 = vrot.lane.b32.xlu1 %v5631_v9, %s4171_s11 }
 0x140   : > { %v1169_v19 = vpop.permute.xlu1 %1168  ;;  %v585_v20 = vpop.permute.xlu0 %584 }
 0x141   : > { %v596_v21 = vsel %vm594_vm6, %v583_v16, %v585_v20 }
 0x142   : > { %3424 = vmatprep.subr.msk.mxu0 %vm4546_vm5, %v596_v21 }
 0x143   : > { %3924 = vrot.lane.b32.xlu0 %v5631_v9, %s4171_s11  ;;  %3929 = vrot.lane.b32.xlu1 %v5631_v9, %s4168_s26 }
 0x144   : > { %v3875_v22 = vpop.permute.xlu1 %3874 }
 0x145   : > { %v3870_v23 = vpop.permute.xlu0 %3869  ;;  %v3876_v24 = vunpack.i.l.bf16 %v3875_v22  ;;  %v3877_v40 = vunpack.i.h.bf16 %v3875_v22 }
 0x146   : > { %v3871_v25 = vunpack.i.l.bf16 %v3870_v23  ;;  %v3872_v35 = vunpack.i.h.bf16 %v3870_v23 }
 0x147   : > { %3934 = vrot.lane.b32.xlu0 %v5631_v9, %s4173_s28  ;;  %3939 = vrot.lane.b32.xlu1 %v5631_v9, %s4168_s26 }
 0x148   : > { %v1021_v27 = vpop.permute.xlu1 %1020  ;;  %v1175_v28 = vsel %vm545_vm8, %v1169_v19, %v3871_v25 }
 0x149   : > { %v430_v29 = vpop.permute.xlu0 %429  ;;  %3480 = vmatprep.subr.msk.mxu1 %vm4501_vm2, %v1175_v28 }
 0x14a   : > { %v441_v30 = vsel %vm439_vm7, %v3876_v24, %v430_v29 }
 0x14b   : > { %3425 = vmatpush3.msk.msra.mxu0 %vm4501_vm2, %v441_v30  ;;  %3944 = vrot.lane.b32.xlu0 %v5631_v9, %s4173_s28 }
 0x14c   : > { %v579_v32 = vpop.permute.xlu1 %578  ;;  %3949 = vrot.lane.b32.xlu1 %v5631_v9, %s4170_s10 }
 0x14d   : > { %v1023_v33 = vpop.permute.xlu0 %1022 }
 0x14e   : > { %v1027_v34 = vsel %vm392_vm9, %v1021_v27, %v1023_v33 }
 0x14f   : > { %3481 = vmatpush3.msra.mxu1 %v1027_v34  ;;  %3954 = vrot.lane.b32.xlu0 %v5631_v9, %s4174_s6 }
 0x150   : > { %v1165_v36 = vpop.permute.xlu1 %1164  ;;  %3959 = vrot.lane.b32.xlu1 %v5631_v9, %s4170_s10 }
 0x151   : > { %v1174_v37 = vsel %vm545_vm8, %v1165_v36, %v3872_v35  ;;  %v581_v38 = vpop.permute.xlu0 %580 }
 0x152   : > { %v595_v39 = vsel %vm594_vm6, %v579_v32, %v581_v38  ;;  %3482 = vmatprep.subr.msk.mxu1 %vm4501_vm2, %v1174_v37 }
 0x153   : > { %3426 = vmatprep.subr.msk.mxu0 %vm4546_vm5, %v595_v39 }
 0x154   : > { %v1017_v41 = vpop.permute.xlu1 %1016 }
 0x155   : > { %v426_v42 = vpop.permute.xlu0 %425 }
 0x156   : > { %v440_v43 = vsel %vm439_vm7, %v3877_v40, %v426_v42 }
 0x157   : > { %3427 = vmatpush3.msk.msra.mxu0 %vm4501_vm2, %v440_v43 }
 0x158   : > { %v542_v44 = vpop.permute.xlu1 %541 }
 0x159   : > { %v1019_v45 = vpop.permute.xlu0 %1018 }
 0x15a   : > { %v1026_v46 = vsel %vm392_vm9, %v1017_v41, %v1019_v45 }
 0x15b   : > { %3483 = vmatpush3.msra.mxu1 %v1026_v46 }
 0x15c   : > { %v1161_v47 = vpop.permute.xlu1 %1160 }
 0x15d   : > { %v544_v48 = vpop.permute.xlu0 %543 }
 0x15e   : > { %v549_v49 = vsel %vm545_vm8, %v542_v44, %v544_v48 }
 0x15f   : > { %3428 = vmatprep.subr.msk.mxu0 %vm4501_vm2, %v549_v49 }
 0x160   : > { %v3885_v50 = vpop.permute.xlu1 %3884 }
 0x161   : > { %v3880_v51 = vpop.permute.xlu0 %3879  ;;  %v3886_v52 = vunpack.i.l.bf16 %v3885_v50  ;;  %v3887_v14 = vunpack.i.h.bf16 %v3885_v50 }
 0x162   : > { %v3881_v53 = vunpack.i.l.bf16 %v3880_v51  ;;  %v3882_v63 = vunpack.i.h.bf16 %v3880_v51 }
 0x164   : > { %v1013_v54 = vpop.permute.xlu1 %1012  ;;  %v1173_v57 = vsel %vm545_vm8, %v1161_v47, %v3881_v53 }
 0x165   : > { %v391_v58 = vpop.permute.xlu0 %390  ;;  %3484 = vmatprep.subr.msk.mxu1 %vm4501_vm2, %v1173_v57 }
 0x166   : > { %v396_v59 = vsel %vm392_vm9, %v3886_v52, %v391_v58  ;;  %v705_v52 = vld [vmem:[#allocation9] sm:$0xff] }
 0x167   : > { %3429 = vmatpush3.msra.mxu0 %v396_v59 }
 0x168   : > { %v538_v60 = vpop.permute.xlu1 %537 }
 0x169   : > { %v1015_v61 = vpop.permute.xlu0 %1014 }
 0x16a   : > { %v1025_v62 = vsel %vm392_vm9, %v1013_v54, %v1015_v61 }
 0x16b   : > { %3485 = vmatpush3.msra.mxu1 %v1025_v62 }
 0x16c   : > { %v1157_v10 = vpop.permute.xlu1 %1156 }
 0x16d   : > { %v1172_v11 = vsel %vm545_vm8, %v1157_v10, %v3882_v63  ;;  %v540_v12 = vpop.permute.xlu0 %539 }
 0x16e   : > { %v548_v13 = vsel %vm545_vm8, %v538_v60, %v540_v12  ;;  %3486 = vmatprep.subr.msk.mxu1 %vm4501_vm2, %v1172_v11  ;;  %v712_v60 = vld [vmem:[#allocation9 + $0x38] sm:$0xff]  ;;  %v711_v11 = vld [vmem:[#allocation9 + $0x30] sm:$0xff] }
 0x16f   : > { %3430 = vmatprep.subr.msk.mxu0 %vm4501_vm2, %v548_v13  ;;  %v715_v13 = vld [vmem:[#allocation9 + $0x50] sm:$0xff] }
 0x170   : > { %v1009_v16 = vpop.permute.xlu1 %1008 }
 0x171   : > { %v387_v17 = vpop.permute.xlu0 %386 }
 0x172   : > { %v395_v18 = vsel %vm392_vm9, %v3887_v14, %v387_v17  ;;  %v714_v17 = vld [vmem:[#allocation9 + $0x48] sm:$0xff] }
 0x173   : > { %3431 = vmatpush3.msra.mxu0 %v395_v18 }
 0x174   : > { %v534_v19 = vpop.permute.xlu1 %533 }
 0x175   : > { %v1011_v20 = vpop.permute.xlu0 %1010 }
 0x176   : > { %v1024_v21 = vsel %vm392_vm9, %v1009_v16, %v1011_v20 }
 0x177   : > { %3487 = vmatpush3.msra.mxu1 %v1024_v21 }
 0x178   : > { %v3890_v22 = vpop.permute.xlu1 %3889  ;;  %3488 = vmatprep.subr.mxu1 %v4364_v2 }
 0x179   : > { %v536_v23 = vpop.permute.xlu0 %535  ;;  %v3891_v24 = vunpack.i.l.bf16 %v3890_v22  ;;  %v3892_v34 = vunpack.i.h.bf16 %v3890_v22 }
 0x17a   : > { %v547_v25 = vsel %vm545_vm8, %v534_v19, %v536_v23 }
 0x17b   : > { %3432 = vmatprep.subr.msk.mxu0 %vm4501_vm2, %v547_v25 }
 0x17c   : > { %v973_v27 = vpop.permute.xlu1 %972 }
 0x17d   : > { %v383_v28 = vpop.permute.xlu0 %382 }
 0x17e   : > { %v394_v29 = vsel %vm392_vm9, %v3891_v24, %v383_v28 }
 0x17f   : > { %3433 = vmatpush3.msra.mxu0 %v394_v29 }
 0x180   : > { %v530_v30 = vpop.permute.xlu1 %529 }
 0x181   : > { %v975_v32 = vpop.permute.xlu0 %974 }
 0x182   : > { %v979_v33 = vsel %vm343_vm10, %v973_v27, %v975_v32 }
 0x183   : > { %3489 = vmatpush3.msk.msra.mxu1 %vm4546_vm5, %v979_v33 }
 0x184   : > { %v379_v2 = vpop.permute.xlu1 %378  ;;  %3490 = vmatprep.subr.mxu1 %v4367_v3 }
 0x185   : > { %v532_v35 = vpop.permute.xlu0 %531  ;;  %v393_v36 = vsel %vm392_vm9, %v3892_v34, %v379_v2 }
 0x186   : > { %v546_v37 = vsel %vm545_vm8, %v530_v30, %v532_v35 }
 0x187   : > { %3434 = vmatprep.subr.msk.mxu0 %vm4501_vm2, %v546_v37 }
 0x188   : > { %3435 = vmatpush3.msra.mxu0 %v393_v36  ;;  %v971_v38 = vpop.permute.xlu1 %970 }
 0x189   : > { %v969_v39 = vpop.permute.xlu0 %968  ;;  %3436 = vmatprep.subr.mxu0 %v4354_v0 }
 0x18a   : > { %v978_v40 = vsel %vm343_vm10, %v969_v39, %v971_v38 }
 0x18b   : > { %3491 = vmatpush3.msk.msra.mxu1 %vm4546_vm5, %v978_v40 }
 0x18c   : > { %v342_v41 = vpop.permute.xlu1 %341  ;;  %3492 = vmatprep.subr.mxu1 %v4374_v4 }
 0x18d   : > { %v3895_v3 = vpop.permute.xlu0 %3894 }
 0x18e   : > { %v3896_v42 = vunpack.i.l.bf16 %v3895_v3  ;;  %v3897_v0 = vunpack.i.h.bf16 %v3895_v3 }
 0x190   : > { %v967_v43 = vpop.permute.xlu1 %966  ;;  %v347_v44 = vsel %vm343_vm10, %v3896_v42, %v342_v41 }
 0x191   : > { %v965_v45 = vpop.permute.xlu0 %964  ;;  %3437 = vmatpush3.msk.msra.mxu0 %vm4546_vm5, %v347_v44 }
 0x192   : > { %v977_v46 = vsel %vm343_vm10, %v965_v45, %v967_v43  ;;  %3438 = vmatprep.subr.mxu0 %v4357_v1 }
 0x193   : > { %3493 = vmatpush3.msk.msra.mxu1 %vm4546_vm5, %v977_v46 }
 0x194   : > { %v961_v47 = vpop.permute.xlu1 %960  ;;  %3494 = vmatprep.subr.mxu1 %v4386_v7  ;;  %v709_v7 = vld [vmem:[#allocation9 + $0x20] sm:$0xff] }
 0x195   : > { %v338_v4 = vpop.permute.xlu0 %337 }
 0x196   : > { %v346_v48 = vsel %vm343_vm10, %v3897_v0, %v338_v4 }
 0x197   : > { %3439 = vmatpush3.msk.msra.mxu0 %vm4546_vm5, %v346_v48 }
 0x198   : > { %v3900_v49 = vpop.permute.xlu1 %3899  ;;  %3440 = vmatprep.subr.mxu0 %v4377_v5  ;;  %v708_v5 = vld [vmem:[#allocation9 + $0x18] sm:$0xff] }
 0x199   : > { %v963_v50 = vpop.permute.xlu0 %962  ;;  %v3901_v51 = vunpack.i.l.bf16 %v3900_v49  ;;  %v3902_v53 = vunpack.i.h.bf16 %v3900_v49 }
 0x19a   : > { %v976_v1 = vsel %vm343_vm10, %v961_v47, %v963_v50 }
 0x19b   : > { %3495 = vmatpush3.msk.msra.mxu1 %vm4546_vm5, %v976_v1 }
 0x19c   : > { %v330_v54 = vpop.permute.xlu1 %329  ;;  %1453 = vmatmul.mubr.f32.vlgmr.msra.gmra.mxu1 %v705_v52 }
 0x19d   : > { %v334_v57 = vpop.permute.xlu0 %333  ;;  %1457 = vmatprep.mubr.f32.mxu1 %v709_v7  ;;  %v344_v59 = vsel %vm343_vm10, %v3902_v53, %v330_v54 }
 0x19e   : > { %v345_v58 = vsel %vm343_vm10, %v3901_v51, %v334_v57 }
 0x19f   : > { %3441 = vmatpush3.msk.msra.mxu0 %vm4546_vm5, %v345_v58 }
 0x1a0   : > { %3442 = vmatprep.subr.mxu0 %v4389_v8  ;;  %v3905_v61 = vpop.permute.xlu1 %3904  ;;  %1458 = vmatmul.mubr.f32.gmra.mxu1 %v708_v5 }
 0x1a1   : > { %3443 = vmatpush3.msk.msra.mxu0 %vm4546_vm5, %v344_v59  ;;  %v1309_v62 = vpop.permute.xlu0 %1308  ;;  %v3906_v63 = vunpack.i.l.bf16 %v3905_v61  ;;  %1462 = vmatprep.mubr.f32.mxu1 %v712_v60  ;;  %v3907_v10 = vunpack.i.h.bf16 %v3905_v61 }
 0x1a2   : > { %831 = vmatmul.mubr.f32.vlgmr.msra.gmra.mxu0 %v705_v52 }
 0x1a3   : > { %835 = vmatprep.mubr.f32.mxu0 %v709_v7  ;;  %v1315_v12 = vsel %vm688_vm1, %v1309_v62, %v3906_v63 }
 0x1a4   : > { %1463 = vmatmul.mubr.f32.gmra.mxu1 %v711_v11  ;;  %3688 = vmatprep.subr.msk.mxu1 %vm4501_vm2, %v1315_v12  ;;  %v1301_v14 = vpop.permute.xlu1 %1300 }
 0x1a5   : > { %v1305_v8 = vpop.permute.xlu0 %1304  ;;  %3689 = vmatpush3.msk.msra.mxu1 %vm4501_vm2, %v1315_v12  ;;  %1467 = vmatprep.mubr.f32.mxu1 %v715_v13 }
 0x1a6   : > { %836 = vmatmul.mubr.f32.gmra.mxu0 %v708_v5  ;;  %v1314_v16 = vsel %vm688_vm1, %v1305_v8, %v3907_v10 }
 0x1a7   : > { %840 = vmatprep.mubr.f32.mxu0 %v712_v60  ;;  %3690 = vmatprep.subr.msk.mxu1 %vm4501_vm2, %v1314_v16 }
 0x1a8   : > { %3691 = vmatpush3.msk.msra.mxu1 %vm4501_vm2, %v1314_v16 }
 0x1a9   : > { %v1303_v18 = vpop.permute.xlu0 %1302  ;;  %1468 = vmatmul.mubr.f32.gmra.mxu1 %v714_v17  ;;  %v1297_v20 = vpop.permute.xlu1 %1296 }
 0x1aa   : > { %841 = vmatmul.mubr.f32.gmra.mxu0 %v711_v11  ;;  %v1313_v19 = vsel %vm688_vm1, %v1301_v14, %v1303_v18  ;;  %3696 = vmatprep.mubr.msk.f32.mxu1 %vm753_vm0, %v4379_v6  ;;  %v3684_v6 = vpop.f32.mrf.mxu1 }
 0x1ab   : > { %845 = vmatprep.mubr.f32.mxu0 %v715_v13  ;;  %3692 = vmatprep.subr.msk.mxu1 %vm4501_vm2, %v1313_v19 }
 0x1ac   : > { %3693 = vmatpush3.msk.msra.mxu1 %vm4501_vm2, %v1313_v19  ;;  %v917_v23 = vpop.f32.mrf.mxu1 }
 0x1ad   : > { %v1299_v21 = vpop.permute.xlu0 %1298  ;;  %v4933_v7 = vpop.permute.xlu1 %3909 }
 0x1ae   : > { %846 = vmatmul.mubr.f32.gmra.mxu0 %v714_v17  ;;  %v1312_v22 = vsel %vm688_vm1, %v1297_v20, %v1299_v21 }
 0x1af   : > { %3694 = vmatprep.subr.msk.mxu1 %vm4501_vm2, %v1312_v22 }
 0x1b0   : > { %3695 = vmatpush3.msk.msra.mxu1 %vm4501_vm2, %v1312_v22 }
 0x1b1   : > { %3697 = vmatmul.mubr.msk.f32.vlgmr.msra.gmra.mxu1 %vm753_vm0, %v4529_v26  ;;  %v4939_v57 = vpop.permute.xlu0 %3914  ;;  %v4947_v59 = vpop.permute.xlu1 %3919 }
 0x1b2   : > { %3699 = vmatprep.mubr.msk.f32.mxu1 %vm753_vm0, %v4680_v55 }
 0x1b5   : > { %3700 = vmatmul.mubr.msk.f32.gmra.mxu1 %vm753_vm0, %v4682_v56  ;;  %v4949_v62 = vpop.permute.xlu0 %3924  ;;  %v4957_v10 = vpop.permute.xlu1 %3929 }
 0x1b9   : > { %v4963_v11 = vpop.permute.xlu0 %3934  ;;  %v4969_v12 = vpop.permute.xlu1 %3939 }
 0x1bd   : > { %v4971_v13 = vpop.permute.xlu0 %3944 }
 0x1be   : > { %v4977_v8 = vpop.permute.xlu1 %3949 }
 0x1c0   : > { %v3687_v34 = vpop.f32.mrf.mxu1 }
 0x1c1   : > { %v4983_v14 = vpop.permute.xlu0 %3954 }
 0x1c2   : > { %v927_v36 = vpop.f32.mrf.mxu1  ;;  %5668 = vst [vmem:[#allocation23_spill] sm:$0xff] %v4983_v14  ;;  %v4989_v18 = vpop.permute.xlu1 %3959 }
 0x1c3   : > { %5669 = vst [vmem:[#allocation24_spill] sm:$0xff] %v4989_v18 }
 0x25c   : > { %v3496_v39 = vpop.f32.mrf.mxu1 }
 0x25e   : > { %v3497_v41 = vpop.f32.mrf.mxu1 }
 0x25f   : > { %v3498_v52 = vadd.f32 %v3497_v41, %v3496_v39  ;;  %v5071_v41 = vld [vmem:[#allocation11 + $0x8] sm:$0xff] }
 0x260   : > { %v3499_v42 = vpop.f32.mrf.mxu1  ;;  %5675 = vst [vmem:[#allocation30_spill] sm:$0xff] %v5071_v41  ;;  %2074 = vmatprep.mubr.f32.mxu1 %v5071_v41 }
 0x262   : > { %v3444_v26 = vpop.f32.mrf.mxu0  ;;  %v3500_v44 = vpop.f32.mrf.mxu1 }
 0x263   : > { %v3501_v49 = vadd.f32 %v3500_v44, %v3499_v42 }
 0x264   : > { %v3445_v55 = vpop.f32.mrf.mxu0  ;;  %v3502_v46 = vpop.f32.mrf.mxu1 }
 0x265   : > { %v3446_v56 = vadd.f32 %v3445_v55, %v3444_v26  ;;  %v5007_v26 = vld [vmem:[#allocation11 + $0x10] sm:$0xff] }
 0x266   : > { %v3447_v24 = vpop.f32.mrf.mxu0  ;;  %v3503_v47 = vpop.f32.mrf.mxu1  ;;  %5671 = vst [vmem:[#allocation26_spill] sm:$0xff] %v5007_v26  ;;  %3710 = vmatprep.mubr.msk.f32.mxu0 %vm753_vm0, %v5007_v26 }
 0x267   : > { %v918_v25 = vadd.f32 %v3446_v56, %v917_v23  ;;  %v3504_v16 = vadd.f32 %v3503_v47, %v3502_v46 }
 0x268   : > { %v3448_v27 = vpop.f32.mrf.mxu0 }
 0x269   : > { %v4841_v28 = vmax.f32 %v918_v25, 0.0  ;;  %v3449_v29 = vadd.f32 %v3448_v27, %v3447_v24  ;;  %v3505_v4 = vpop.f32.mrf.mxu1 }
 0x26a   : > { %v3450_v33 = vpop.f32.mrf.mxu0 }
 0x26b   : > { %5661 = vst [vmem:[#allocation16_spill] sm:$0xff] %v4841_v28  ;;  %v923_v30 = vadd.f32 %v3684_v6, %v3449_v29  ;;  %1874 = vrot.lane.b32.xlu0 %v4841_v28, %s4168_s26  ;;  %v3506_v48 = vpop.f32.mrf.mxu1 }
 0x26c   : > { %v3451_v2 = vpop.f32.mrf.mxu0  ;;  %v3507_v58 = vadd.f32 %v3506_v48, %v3505_v4 }
 0x26d   : > { %v4845_v32 = vmax.f32 %v923_v30, 0.0  ;;  %v3452_v35 = vadd.f32 %v3451_v2, %v3450_v33 }
 0x26e   : > { %v3453_v40 = vpop.f32.mrf.mxu0 }
 0x26f   : > { %5662 = vst [vmem:[#allocation17_spill] sm:$0xff] %v4845_v32  ;;  %1728 = vrot.lane.b32.xlu1 %v4845_v32, %s4169_s8  ;;  %1724 = vrot.lane.b32.xlu0 %v4841_v28, %s4169_s8  ;;  %v928_v37 = vadd.f32 %v3452_v35, %v927_v36 }
 0x270   : > { %v3454_v3 = vpop.f32.mrf.mxu0 }
 0x271   : > { %v4875_v38 = vmax.f32 %v928_v37, 0.0  ;;  %v3455_v43 = vadd.f32 %v3454_v3, %v3453_v40  ;;  %v3698_v50 = vpop.f32.mrf.mxu1 }
 0x272   : > { %v1545_v51 = vadd.f32 %v3698_v50, %v3501_v49 }
 0x273   : > { %1922 = vrot.lane.b32.xlu1 %v4845_v32, %s4166_s24  ;;  %1918 = vrot.lane.b32.xlu0 %v4841_v28, %s4166_s24  ;;  %5663 = vst [vmem:[#allocation18_spill] sm:$0xff] %v4875_v38  ;;  %v933_v45 = vadd.f32 %v3687_v34, %v3455_v43  ;;  %v1539_v53 = vpop.f32.mrf.mxu1 }
 0x274   : > { %v4919_v1 = vmax.f32 %v1545_v51, 0.0  ;;  %v1540_v54 = vadd.f32 %v3498_v52, %v1539_v53 }
 0x275   : > { %v4897_v0 = vmax.f32 %v933_v45, 0.0  ;;  %v3701_v60 = vpop.f32.mrf.mxu1 }
 0x276   : > { %5665 = vst [vmem:[#allocation20_spill] sm:$0xff] %v4919_v1  ;;  %v4941_v5 = vmax.f32 %v1540_v54, 0.0  ;;  %v1555_v61 = vadd.f32 %v3701_v60, %v3507_v58 }
 0x277   : > { %1680 = vrot.lane.b32.xlu1 %v4845_v32, %s4171_s11  ;;  %1826 = vrot.lane.b32.xlu0 %v4841_v28, %s4170_s10  ;;  %5664 = vst [vmem:[#allocation19_spill] sm:$0xff] %v4897_v0  ;;  %v1549_v17 = vpop.f32.mrf.mxu1 }
 0x278   : > { %5666 = vst [vmem:[#allocation21_spill] sm:$0xff] %v4941_v5  ;;  %v4955_v63 = vmax.f32 %v1555_v61, 0.0  ;;  %v1550_v19 = vadd.f32 %v3504_v16, %v1549_v17 }
 0x27a   : > { %5667 = vst [vmem:[#allocation22_spill] sm:$0xff] %v4955_v63  ;;  %v4997_v21 = vmax.f32 %v1550_v19, 0.0 }
 0x27b   : > { %2344 = vrot.lane.b32.xlu1 %v4845_v32, %s4169_s8  ;;  %1676 = vrot.lane.b32.xlu0 %v4841_v28, %s4171_s11 }
 0x27c   : > { %5670 = vst [vmem:[#allocation25_spill] sm:$0xff] %v4997_v21 }
 0x27f   : > { %1782 = vrot.lane.b32.xlu1 %v4845_v32, %s4172_s12  ;;  %2340 = vrot.lane.b32.xlu0 %v4841_v28, %s4169_s8 }
 0x283   : > { %1636 = vrot.lane.b32.xlu1 %v4845_v32, %s4173_s28  ;;  %1778 = vrot.lane.b32.xlu0 %v4841_v28, %s4172_s12 }
 0x287   : > { %2296 = vrot.lane.b32.xlu1 %v4845_v32, %s4171_s11  ;;  %1632 = vrot.lane.b32.xlu0 %v4841_v28, %s4173_s28 }
 0x28b   : > { %1882 = vrot.lane.b32.xlu1 %v4875_v38, %s4168_s26  ;;  %1878 = vrot.lane.b32.xlu0 %v4845_v32, %s4168_s26 }
 0x28f   : > { %1732 = vrot.lane.b32.xlu1 %v4875_v38, %s4169_s8  ;;  %1830 = vrot.lane.b32.xlu0 %v4845_v32, %s4170_s10 }
 0x293   : > { %1926 = vrot.lane.b32.xlu1 %v4875_v38, %s4166_s24  ;;  %2348 = vrot.lane.b32.xlu0 %v4875_v38, %s4169_s8 }
 0x297   : > { %1834 = vrot.lane.b32.xlu1 %v4875_v38, %s4170_s10  ;;  %1786 = vrot.lane.b32.xlu0 %v4875_v38, %s4172_s12 }
 0x29b   : > { %1684 = vrot.lane.b32.xlu1 %v4875_v38, %s4171_s11  ;;  %1640 = vrot.lane.b32.xlu0 %v4875_v38, %s4173_s28 }
 0x29f   : > { %1886 = vrot.lane.b32.xlu1 %v4897_v0, %s4168_s26  ;;  %2300 = vrot.lane.b32.xlu0 %v4875_v38, %s4171_s11 }
 0x2a3   : > { %1838 = vrot.lane.b32.xlu1 %v4897_v0, %s4170_s10  ;;  %1592 = vrot.lane.b32.xlu0 %v4875_v38, %s4174_s6 }
 0x2a7   : > { %2352 = vrot.lane.b32.xlu1 %v4897_v0, %s4169_s8  ;;  %1736 = vrot.lane.b32.xlu0 %v4897_v0, %s4169_s8 }
 0x2ab   : > { %1790 = vrot.lane.b32.xlu1 %v4897_v0, %s4172_s12  ;;  %1930 = vrot.lane.b32.xlu0 %v4897_v0, %s4166_s24 }
 0x2af   : > { %1644 = vrot.lane.b32.xlu1 %v4897_v0, %s4173_s28  ;;  %1688 = vrot.lane.b32.xlu0 %v4897_v0, %s4171_s11 }
 0x2b3   : > { %2304 = vrot.lane.b32.xlu1 %v4897_v0, %s4171_s11  ;;  %1924 = vrot.lane.b32.xlu0 %v4919_v1, %s4166_s24 }
 0x2b7   : > { %1596 = vrot.lane.b32.xlu1 %v4897_v0, %s4174_s6  ;;  %2496 = vrot.lane.b32.xlu0 %v4919_v1, %s4168_s26 }
 0x2bb   : > { %2346 = vrot.lane.b32.xlu0 %v4919_v1, %s4169_s8  ;;  %1880 = vrot.lane.b32.xlu1 %v4919_v1, %s4168_s26 }
 0x2bf   : > { %1784 = vrot.lane.b32.xlu0 %v4919_v1, %s4172_s12  ;;  %1832 = vrot.lane.b32.xlu1 %v4919_v1, %s4170_s10 }
 0x2c3   : > { %2448 = vrot.lane.b32.xlu0 %v4919_v1, %s4170_s10  ;;  %1876 = vrot.lane.b32.xlu1 %v4941_v5, %s4168_s26 }
 0x2c7   : > { %2298 = vrot.lane.b32.xlu0 %v4919_v1, %s4171_s11  ;;  %1920 = vrot.lane.b32.xlu1 %v4941_v5, %s4166_s24 }
 0x2cb   : > { %1888 = vrot.lane.b32.xlu0 %v4955_v63, %s4168_s26  ;;  %1828 = vrot.lane.b32.xlu1 %v4941_v5, %s4170_s10 }
 0x2cf   : > { %1840 = vrot.lane.b32.xlu0 %v4955_v63, %s4170_s10  ;;  %2492 = vrot.lane.b32.xlu1 %v4941_v5, %s4168_s26 }
 0x2d3   : > { %2504 = vrot.lane.b32.xlu0 %v4955_v63, %s4168_s26  ;;  %2342 = vrot.lane.b32.xlu1 %v4941_v5, %s4169_s8 }
 0x2d7   : > { %2354 = vrot.lane.b32.xlu0 %v4955_v63, %s4169_s8  ;;  %1780 = vrot.lane.b32.xlu1 %v4941_v5, %s4172_s12 }
 0x2db   : > { %1792 = vrot.lane.b32.xlu0 %v4955_v63, %s4172_s12  ;;  %2444 = vrot.lane.b32.xlu1 %v4941_v5, %s4170_s10 }
 0x2dd   : > { %v4991_v20 = vpop.permute.xlu0 %1874 }
 0x2df   : > { %2456 = vrot.lane.b32.xlu0 %v4955_v63, %s4170_s10  ;;  %1932 = vrot.lane.b32.xlu1 %v4955_v63, %s4166_s24 }
 0x2e1   : > { %v4999_v22 = vpop.permute.xlu1 %1728  ;;  %v5001_v6 = vpop.permute.xlu0 %1724 }
 0x2e3   : > { %2306 = vrot.lane.b32.xlu0 %v4955_v63, %s4171_s11  ;;  %2500 = vrot.lane.b32.xlu1 %v4997_v21, %s4168_s26 }
 0x2e5   : > { %v5009_v55 = vpop.permute.xlu1 %1922  ;;  %v5011_v23 = vpop.permute.xlu0 %1918 }
 0x2e7   : > { %1884 = vrot.lane.b32.xlu0 %v4997_v21, %s4168_s26  ;;  %2350 = vrot.lane.b32.xlu1 %v4997_v21, %s4169_s8 }
 0x2e9   : > { %v5019_v56 = vpop.permute.xlu1 %1680  ;;  %v5021_v24 = vpop.permute.xlu0 %1826 }
 0x2eb   : > { %1928 = vrot.lane.b32.xlu0 %v4997_v21, %s4166_s24  ;;  %1788 = vrot.lane.b32.xlu1 %v4997_v21, %s4172_s12 }
 0x2ed   : > { %v5027_v25 = vpop.permute.xlu1 %2344  ;;  %v5029_v27 = vpop.permute.xlu0 %1676 }
 0x2ef   : > { %1836 = vrot.lane.b32.xlu0 %v4997_v21, %s4170_s10  ;;  %2452 = vrot.lane.b32.xlu1 %v4997_v21, %s4170_s10 }
 0x2f1   : > { %v5035_v29 = vpop.permute.xlu1 %1782  ;;  %v5037_v30 = vpop.permute.xlu0 %2340 }
 0x2f3   : > { %3964 = vrot.lane.b32.xlu0 %v5631_v9, %s4174_s6  ;;  %2302 = vrot.lane.b32.xlu1 %v4997_v21, %s4171_s11 }
 0x2f5   : > { %v5043_v33 = vpop.permute.xlu1 %1636  ;;  %v5045_v34 = vpop.permute.xlu0 %1778 }
 0x2f6   : > { %5672 = vst [vmem:[#allocation27_spill] sm:$0xff] %v5045_v34 }
 0x2f7   : > { %2292 = vrot.lane.b32.xlu0 %v4841_v28, %s4171_s11  ;;  %1588 = vrot.lane.b32.xlu1 %v4845_v32, %s4174_s6 }
 0x2f9   : > { %v5051_v2 = vpop.permute.xlu1 %2296  ;;  %v5053_v35 = vpop.permute.xlu0 %1632 }
 0x2fa   : > { %5673 = vst [vmem:[#allocation28_spill] sm:$0xff] %v5051_v2  ;;  %5674 = vst [vmem:[#allocation29_spill] sm:$0xff] %v5053_v35 }
 0x2fb   : > { %2408 = vrot.lane.b32.xlu0 %v4955_v63, %s4172_s12  ;;  %2294 = vrot.lane.b32.xlu1 %v4941_v5, %s4171_s11 }
 0x2fd   : > { %v5059_v36 = vpop.permute.xlu1 %1882  ;;  %v5061_v37 = vpop.permute.xlu0 %1878 }
 0x2ff   : > { %1584 = vrot.lane.b32.xlu0 %v4841_v28, %s4174_s6  ;;  %3969 = vrot.lane.b32.xlu1 %v5631_v9, %s4172_s12 }
 0x301   : > { %v5067_v39 = vpop.permute.xlu1 %1732  ;;  %v5069_v40 = vpop.permute.xlu0 %1830 }
 0x303   : > { %2262 = vrot.lane.b32.xlu0 %v4955_v63, %s4173_s28  ;;  %2260 = vrot.lane.b32.xlu1 %v4897_v0, %s4173_s28 }
 0x305   : > { %v5078_v3 = vpop.permute.xlu1 %1926  ;;  %v5080_v42 = vpop.permute.xlu0 %2348 }
 0x307   : > { %2256 = vrot.lane.b32.xlu0 %v4875_v38, %s4173_s28  ;;  %2404 = vrot.lane.b32.xlu1 %v4997_v21, %s4172_s12 }
 0x309   : > { %v5086_v43 = vpop.permute.xlu1 %1834  ;;  %v5088_v44 = vpop.permute.xlu0 %1786 }
 0x30b   : > { %2400 = vrot.lane.b32.xlu0 %v4919_v1, %s4172_s12  ;;  %2258 = vrot.lane.b32.xlu1 %v4997_v21, %s4173_s28 }
 0x30d   : > { %v5094_v45 = vpop.permute.xlu1 %1684  ;;  %v5096_v46 = vpop.permute.xlu0 %1640 }
 0x30f   : > { %2252 = vrot.lane.b32.xlu0 %v4845_v32, %s4173_s28  ;;  %3974 = vrot.lane.b32.xlu1 %v5631_v9, %s4172_s12 }
 0x311   : > { %v1887_v47 = vpop.permute.xlu1 %1886  ;;  %v5102_v4 = vpop.permute.xlu0 %2300 }
 0x312   : > { %5676 = vst [vmem:[#allocation31_spill] sm:$0xff] %v5102_v4 }
 0x313   : > { %2396 = vrot.lane.b32.xlu0 %v4941_v5, %s4172_s12  ;;  %2254 = vrot.lane.b32.xlu1 %v4919_v1, %s4173_s28  ;;  %s271_s12 = scalar_lea.vmem [#allocation12], %s3279_s17 }
 0x314   : > { %s3178_s7 = sshll.u32 %s271_s12, 4  ;;  %s5577_s7 = int_to_ptr.vmem [resolvable:$true] %s3178_s7 }
 0x315   : > { %v5108_v48 = vpop.permute.xlu1 %1838  ;;  %v5110_v49 = vpop.permute.xlu0 %1592  ;;  %s4089_s14 = scalar_lea.vmem %s5577_s7, 1024 }
 0x316   : > { %5677 = vst [vmem:[#allocation32_spill] sm:$0xff] %v5110_v49  ;;  %p4090_p11 = scmp.ne.s32.totalorder %s5577_s7, %s4089_s14 }
 0x317   : > { %2250 = vrot.lane.b32.xlu0 %v4941_v5, %s4173_s28  ;;  %2248 = vrot.lane.b32.xlu1 %v4841_v28, %s4173_s28 }
 0x318   : > { %p4091_p1 = pnand %p4090_p11, %p5711_p10 }
 0x319   : > { %v5116_v50 = vpop.permute.xlu1 %2352  ;;  %v1737_v51 = vpop.permute.xlu0 %1736 }
 0x31a   : > { %p4092_p2 = pneg %p4091_p1 }
 0x31b   : > { %2214 = vrot.lane.b32.xlu0 %v4955_v63, %s4174_s6  ;;  %2212 = vrot.lane.b32.xlu1 %v4897_v0, %s4174_s6 }
 0x31d   : > { %v5122_v52 = vpop.permute.xlu1 %1790  ;;  %v1931_v53 = vpop.permute.xlu0 %1930 }
 0x31f   : > { %3979 = vrot.lane.b32.xlu0 %v5631_v9, %s4166_s24  ;;  %2548 = vrot.lane.b32.xlu1 %v4955_v63, %s4166_s24  ;;  %v5680_v63 = vmov 0.0  }
 0x321   : > { %v5128_v54 = vpop.permute.xlu1 %1644  ;;  %v5130_v58 = vpop.permute.xlu0 %1688 }
 0x323   : > { %2210 = vrot.lane.b32.xlu0 %v4997_v21, %s4174_s6  ;;  %2208 = vrot.lane.b32.xlu1 %v4875_v38, %s4174_s6  ;;  %v3911_v38 = vunpack.i.l.bf16 %v4933_v7 }
 0x325   : > { %v5136_v60 = vpop.permute.xlu1 %2304  ;;  %v5138_v61 = vpop.permute.xlu0 %1924 }
 0x326   : > { %5678 = vst [vmem:[#allocation33_spill] sm:$0xff] %v5136_v60 }
 0x327   : > { %2204 = vrot.lane.b32.xlu0 %v4845_v32, %s4174_s6  ;;  %2544 = vrot.lane.b32.xlu1 %v4997_v21, %s4166_s24 }
 0x329   : > { %v5144_v16 = vpop.permute.xlu1 %1596  ;;  %v5146_v17 = vpop.permute.xlu0 %2496 }
 0x32a   : > { %5679 = vst [vmem:[#allocation34_spill] sm:$0xff] %v5144_v16  ;;  %v1741_v16 = vsel %vm488_vm4, %v3911_v38, %v1737_v51 }
 0x32b   : > { %2540 = vrot.lane.b32.xlu0 %v4919_v1, %s4166_s24  ;;  %2206 = vrot.lane.b32.xlu1 %v4919_v1, %s4174_s6 }
 0x32d   : > { %v5152_v19 = vpop.permute.xlu0 %2346  ;;  %v1881_v9 = vpop.permute.xlu1 %1880 }
 0x32f   : > { %2200 = vrot.lane.b32.xlu0 %v4841_v28, %s4174_s6  ;;  %2542 = vrot.lane.b32.xlu1 %v5680_v63, %s4166_s24 }
 0x331   : > { %v5158_v21 = vpop.permute.xlu0 %1784  ;;  %v5160_v26 = vpop.permute.xlu1 %1832 }
 0x333   : > { %2536 = vrot.lane.b32.xlu0 %v4941_v5, %s4166_s24  ;;  %2202 = vrot.lane.b32.xlu1 %v4941_v5, %s4174_s6  ;;  %s3315_s6 = sshll.u32 %s4231_s22, 10  ;;  %s3165_s22 = scalar_lea.sflag [#allocation8], %s4337_s16 }
 0x334   : > { %s5571_s13 = scalar_lea.hbm %s5626_s5, %s3315_s6 }
 0x335   : > { %v5166_v1 = vpop.permute.xlu0 %2448  ;;  %v1877_v41 = vpop.permute.xlu1 %1876 }
 0x336   : > { %5681 = vst [vmem:[#allocation35_spill] sm:$0xff] %v5166_v1 }
 0x337   : > { %2538 = vrot.lane.b32.xlu1 %v5680_v63, %s4166_s24  ;;  %s4093_s24 = sshll.u32 %s4178_s29, 4  ;;  %s4094_s24 = int_to_ptr.vmem [resolvable:$false] %s4093_s24 }
 0x338   : > { %p4096_p6 = scmp.lt.s32.totalorder %s5577_s7, %s4094_s24 }
 0x339   : > { %v5170_v28 = vpop.permute.xlu0 %2298  ;;  %v1921_v32 = vpop.permute.xlu1 %1920 }
 0x33a   : > { %5682 = vst [vmem:[#allocation36_spill] sm:$0xff] %v5170_v28 }
 0x33d   : > { %v1889_v49 = vpop.permute.xlu0 %1888  ;;  %v5173_v2 = vpop.permute.xlu1 %1828 }
 0x33e   : > { %v1893_v0 = vsel %vm643_vm3, %v1887_v47, %v1889_v49 }
 0x33f   : > { %3516 = vmatprep.subr.mxu1 %v1893_v0 }
 0x340   : > { %3517 = vmatpush3.msk.msra.mxu1 %vm4546_vm5, %v1741_v16  ;;  %v3912_v16 = vunpack.i.h.bf16 %v4933_v7 }
 0x341   : > { %v1841_v5 = vpop.permute.xlu0 %1840  ;;  %v5179_v1 = vpop.permute.xlu1 %2492 }
 0x345   : > { %v2505_v63 = vpop.permute.xlu0 %2504  ;;  %v5181_v4 = vpop.permute.xlu1 %2342 }
 0x349   : > { %v5183_v28 = vpop.permute.xlu0 %2354  ;;  %v5185_v35 = vpop.permute.xlu1 %1780 }
 0x34a   : > { %5683 = vst [vmem:[#allocation37_spill] sm:$0xff] %v5185_v35  ;;  %v3916_v35 = vunpack.i.l.bf16 %v4939_v57 }
 0x34c   : > { %v1739_v7 = vsel %vm488_vm4, %v3916_v35, %v4999_v22  ;;  %v1935_v22 = vsel %vm688_vm1, %v5009_v55, %v5138_v61  ;;  %v1845_v35 = vsel %vm594_vm6, %v5108_v48, %v1841_v5  ;;  %v3931_v5 = vunpack.i.l.bf16 %v4957_v10 }
 0x34d   : > { %v5187_v18 = vpop.permute.xlu0 %1792  ;;  %v5189_v14 = vpop.permute.xlu1 %2444  ;;  %v3932_v48 = vunpack.i.h.bf16 %v4957_v10  ;;  %v3941_v10 = vunpack.i.l.bf16 %v4969_v12 }
 0x34e   : > { %5684 = vst [vmem:[#allocation38_spill] sm:$0xff] %v5189_v14 }
 0x351   : > { %v5191_v47 = vpop.permute.xlu0 %2456  ;;  %v1933_v38 = vpop.permute.xlu1 %1932 }
 0x352   : > { %v1937_v0 = vsel %vm688_vm1, %v1931_v53, %v1933_v38  ;;  %v1740_v53 = vsel %vm488_vm4, %v3912_v16, %v5067_v39  ;;  %v1891_v38 = vsel %vm643_vm3, %v5061_v37, %v1881_v9  ;;  %v3921_v9 = vunpack.i.l.bf16 %v4947_v59 }
 0x353   : > { %3702 = vmatprep.subr.msk.mxu0 %vm4501_vm2, %v1937_v0  ;;  %v1934_v39 = vsel %vm688_vm1, %v5011_v23, %v1921_v32  ;;  %v5262_v32 = vld [vmem:[#allocation11 + $0x28] sm:$0xff]  ;;  %v1843_v23 = vsel %vm594_vm6, %v5069_v40, %v5160_v26  ;;  %v1842_v40 = vsel %vm594_vm6, %v5021_v24, %v5173_v2  ;;  %v1797_v24 = vsel %vm545_vm8, %v5122_v52, %v5187_v18 }
 0x354   : > { %3703 = vmatpush3.msk.msra.mxu0 %vm4501_vm2, %v1937_v0  ;;  %v3917_v0 = vunpack.i.h.bf16 %v4939_v57  ;;  %v2509_v18 = vsel %vm643_vm3, %v5146_v17, %v3941_v10  ;;  %v3951_v52 = vunpack.i.l.bf16 %v4977_v8  ;;  %v2356_v17 = vsel %vm488_vm4, %v5037_v30, %v5181_v4  ;;  %v5686_v30 = vld [vmem:[#allocation37_spill] sm:$0xff]  ;;  %v5687_v4 = vld [vmem:[#allocation27_spill] sm:$0xff] }
 0x355   : > { %v5198_v49 = vpop.permute.xlu0 %2306  ;;  %v5200_v51 = vpop.permute.xlu1 %2500 }
 0x356   : > { %5685 = vst [vmem:[#allocation39_spill] sm:$0xff] %v5198_v49  ;;  %v1738_v57 = vsel %vm488_vm4, %v3917_v0, %v5001_v6  ;;  %v1693_v6 = vsel %vm439_vm7, %v3921_v9, %v5130_v58  ;;  %v5691_v0 = vld [vmem:[#allocation24_spill] sm:$0xff] }
 0x359   : > { %v1885_v60 = vpop.permute.xlu0 %1884  ;;  %v2351_v34 = vpop.permute.xlu1 %2350 }
 0x35a   : > { %v1892_v14 = vsel %vm643_vm3, %v5059_v36, %v1885_v60  ;;  %v2358_v2 = vsel %vm488_vm4, %v5080_v42, %v2351_v34  ;;  %v3946_v42 = vunpack.i.l.bf16 %v4971_v13 }
 0x35b   : > { %3518 = vmatprep.subr.mxu1 %v1892_v14  ;;  %v1890_v14 = vsel %vm643_vm3, %v4991_v20, %v1877_v41  ;;  %v3922_v20 = vunpack.i.h.bf16 %v4947_v59  ;;  %v3926_v41 = vunpack.i.l.bf16 %v4949_v62 }
 0x35c   : > { %3519 = vmatpush3.msk.msra.mxu1 %vm4546_vm5, %v1740_v53  ;;  %v1647_v16 = vsel %vm392_vm9, %v3946_v42, %v5043_v33  ;;  %v5690_v33 = vld [vmem:[#allocation23_spill] sm:$0xff] }
 0x35d   : > { %v1929_v49 = vpop.permute.xlu0 %1928  ;;  %3520 = vmatprep.subr.mxu1 %v1891_v38  ;;  %v5215_v36 = vpop.permute.xlu1 %1788  ;;  %v1691_v58 = vsel %vm439_vm7, %v3926_v41, %v5019_v56  ;;  %v5688_v53 = vld [vmem:[#allocation39_spill] sm:$0xff]  ;;  %v3957_v9 = vunpack.i.h.bf16 %v5690_v33 }
 0x35e   : > { %v1936_v60 = vsel %vm688_vm1, %v5078_v3, %v1929_v49  ;;  %3521 = vmatpush3.msk.msra.mxu1 %vm4546_vm5, %v1739_v7  ;;  %v1692_v3 = vsel %vm439_vm7, %v3922_v20, %v5094_v45  ;;  %v3927_v45 = vunpack.i.h.bf16 %v4949_v62  ;;  %v2359_v62 = vsel %vm488_vm4, %v5116_v50, %v5183_v28  ;;  %v5694_v20 = vld [vmem:[#allocation34_spill] sm:$0xff] }
 0x35f   : > { %3522 = vmatprep.subr.mxu1 %v1890_v14  ;;  %3704 = vmatprep.subr.msk.mxu0 %vm4501_vm2, %v1936_v60  ;;  %v2510_v28 = vsel %vm643_vm3, %v5200_v51, %v3932_v48  ;;  %v3942_v50 = vunpack.i.h.bf16 %v4969_v12  ;;  %v1796_v12 = vsel %vm545_vm8, %v5088_v44, %v5215_v36  ;;  %v1795_v44 = vsel %vm545_vm8, %v5035_v29, %v5158_v21  ;;  %v5692_v36 = vld [vmem:[#allocation29_spill] sm:$0xff]  ;;  %v5699_v48 = vld [vmem:[#allocation32_spill] sm:$0xff] }
 0x360   : > { %3523 = vmatpush3.msk.msra.mxu1 %vm4546_vm5, %v1738_v57  ;;  %3705 = vmatpush3.msk.msra.mxu0 %vm4501_vm2, %v1936_v60  ;;  %v1690_v56 = vsel %vm439_vm7, %v3927_v45, %v5029_v27  ;;  %v3937_v27 = vunpack.i.h.bf16 %v4963_v11  ;;  %v3961_v7 = vunpack.i.l.bf16 %v5691_v0  ;;  %v5693_v57 = vld [vmem:[#allocation31_spill] sm:$0xff] }
 0x361   : > { %v1837_v37 = vpop.permute.xlu0 %1836  ;;  %3524 = vmatprep.subr.msk.mxu1 %vm4546_vm5, %v1845_v35  ;;  %3706 = vmatprep.subr.msk.mxu0 %vm4501_vm2, %v1935_v22  ;;  %v5244_v55 = vpop.permute.xlu1 %2452  ;;  %v3962_v35 = vunpack.i.h.bf16 %v5691_v0 }
 0x362   : > { %v1844_v59 = vsel %vm594_vm6, %v5086_v43, %v1837_v37  ;;  %3525 = vmatpush3.msk.msra.mxu1 %vm4501_vm2, %v1693_v6  ;;  %3707 = vmatpush3.msk.msra.mxu0 %vm4501_vm2, %v1935_v22  ;;  %v2511_v43 = vsel %vm643_vm3, %v2505_v63, %v3931_v5  ;;  %v3936_v63 = vunpack.i.l.bf16 %v4963_v11  ;;  %v2357_v11 = vsel %vm488_vm4, %v5027_v25, %v5152_v19  ;;  %v5695_v37 = vld [vmem:[#allocation35_spill] sm:$0xff] }
 0x363   : > { %3526 = vmatprep.subr.msk.mxu1 %vm4546_vm5, %v1844_v59  ;;  %3708 = vmatprep.subr.msk.mxu0 %vm4501_vm2, %v1934_v39  ;;  %v2508_v25 = vsel %vm643_vm3, %v5179_v1, %v3942_v50  ;;  %v3952_v19 = vunpack.i.h.bf16 %v4977_v8  ;;  %v2463_v1 = vsel %vm594_vm6, %v5191_v47, %v3951_v52  ;;  %v5689_v8 = vld [vmem:[#allocation33_spill] sm:$0xff]  ;;  %v3956_v47 = vunpack.i.l.bf16 %v5690_v33  ;;  %v5696_v59 = vld [vmem:[#allocation19_spill] sm:$0xff]  ;;  %v5406_v50 = vld [vmem:[#allocation11 + $0x40] sm:$0xff] }
 0x364   : > { %3527 = vmatpush3.msk.msra.mxu1 %vm4501_vm2, %v1692_v3  ;;  %3709 = vmatpush3.msk.msra.mxu0 %vm4501_vm2, %v1934_v39  ;;  %v1649_v49 = vsel %vm392_vm9, %v3936_v63, %v5128_v54  ;;  %v1648_v54 = vsel %vm392_vm9, %v3937_v27, %v5096_v46  ;;  %v3947_v46 = vunpack.i.h.bf16 %v4971_v13  ;;  %v1794_v13 = vsel %vm545_vm8, %v5687_v4, %v5686_v30  ;;  %v5697_v3 = vld [vmem:[#allocation36_spill] sm:$0xff] }
 0x365   : > { %v5276_v61 = vpop.permute.xlu0 %3964  ;;  %3528 = vmatprep.subr.msk.mxu1 %vm4546_vm5, %v1843_v23  ;;  %3568 = vmatprep.subr.mxu0 %v2511_v43  ;;  %v2303_v26 = vpop.permute.xlu1 %2302  ;;  %v2311_v38 = vsel %vm439_vm7, %v5689_v8, %v5688_v53  ;;  %v2462_v14 = vsel %vm594_vm6, %v5244_v55, %v3952_v19  ;;  %v1601_v6 = vsel %vm343_vm10, %v3956_v47, %v5694_v20  ;;  %v5698_v23 = vld [vmem:[#allocation28_spill] sm:$0xff]  ;;  %v5707_v20 = vld [vmem:[#allocation25_spill] sm:$0xff] }
 0x366   : > { %3529 = vmatpush3.msk.msra.mxu1 %vm4501_vm2, %v1691_v58  ;;  %3711 = vmatmul.mubr.msk.f32.vlgmr.msra.gmra.mxu0 %vm753_vm0, %v5262_v32  ;;  %v1646_v60 = vsel %vm392_vm9, %v3947_v46, %v5692_v36  ;;  %v2310_v22 = vsel %vm439_vm7, %v5693_v57, %v2303_v26  ;;  %v2461_v55 = vsel %vm594_vm6, %v5695_v37, %v3961_v7  ;;  %v3966_v5 = vunpack.i.l.bf16 %v5276_v61  ;;  %v5700_v26 = vld [vmem:[#allocation38_spill] sm:$0xff] }
 0x367   : > { %3569 = vmatpush3.msk.msra.mxu0 %vm4546_vm5, %v2359_v62  ;;  %3530 = vmatprep.subr.msk.mxu1 %vm4546_vm5, %v1842_v40  ;;  %v2309_v43 = vsel %vm439_vm7, %v5698_v23, %v5697_v3  ;;  %v1600_v58 = vsel %vm343_vm10, %v3957_v9, %v5699_v48  ;;  %v2460_v40 = vsel %vm594_vm6, %v5700_v26, %v3962_v35  ;;  %v5701_v62 = vld [vmem:[#allocation18_spill] sm:$0xff]  ;;  %v5708_v23 = vld [vmem:[#allocation20_spill] sm:$0xff] }
 0x368   : > { %3570 = vmatprep.subr.mxu0 %v2510_v28  ;;  %3531 = vmatpush3.msk.msra.mxu1 %vm4501_vm2, %v1690_v56  ;;  %v3967_v56 = vunpack.i.h.bf16 %v5276_v61  ;;  %v5413_v61 = vld [vmem:[#allocation11] sm:$0xff]  ;;  %v5705_v7 = vld [vmem:[#allocation26_spill] sm:$0xff] }
 0x369   : > { %3571 = vmatpush3.msk.msra.mxu0 %vm4546_vm5, %v2358_v2  ;;  %v2293_v51 = vpop.permute.xlu0 %2292  ;;  %3532 = vmatprep.subr.msk.mxu1 %vm4501_vm2, %v1797_v24  ;;  %v1589_v34 = vpop.permute.xlu1 %1588  ;;  %v5702_v2 = vld [vmem:[#allocation17_spill] sm:$0xff]  ;;  %v5706_v9 = vld [vmem:[#allocation22_spill] sm:$0xff] }
 0x36a   : > { %3572 = vmatprep.subr.mxu0 %v2509_v18  ;;  %3533 = vmatpush3.msra.mxu1 %v1649_v49  ;;  %v1599_v28 = vsel %vm343_vm10, %v3966_v5, %v1589_v34  ;;  %v5703_v34 = vld [vmem:[#allocation16_spill] sm:$0xff] }
 0x36b   : > { %3573 = vmatpush3.msk.msra.mxu0 %vm4546_vm5, %v2357_v11  ;;  %3534 = vmatprep.subr.msk.mxu1 %vm4501_vm2, %v1796_v12  ;;  %v5419_v11 = vld [vmem:[#allocation11 + $0x20] sm:$0xff] }
 0x36c   : > { %3574 = vmatprep.subr.mxu0 %v2508_v25  ;;  %3535 = vmatpush3.msra.mxu1 %v1648_v54  ;;  %v5430_v25 = vld [vmem:[#allocation11 + $0x18] sm:$0xff] }
 0x36d   : > { %3575 = vmatpush3.msk.msra.mxu0 %vm4546_vm5, %v2356_v17  ;;  %v2409_v21 = vpop.permute.xlu0 %2408  ;;  %3536 = vmatprep.subr.msk.mxu1 %vm4501_vm2, %v1795_v44  ;;  %v2295_v29 = vpop.permute.xlu1 %2294  ;;  %v5704_v44 = vld [vmem:[#allocation30_spill] sm:$0xff]  ;;  %v5435_v17 = vld [vmem:[#allocation11 + $0x38] sm:$0xff] }
 0x36e   : > { %3576 = vmatprep.subr.msk.mxu0 %vm4546_vm5, %v2463_v1  ;;  %3537 = vmatpush3.msra.mxu1 %v1647_v16  ;;  %v2308_v63 = vsel %vm439_vm7, %v2293_v51, %v2295_v29  ;;  %v5415_v51 = vld [vmem:[#allocation11 + $0x58] sm:$0xff]  ;;  %v5440_v1 = vld [vmem:[#allocation11 + $0x30] sm:$0xff] }
 0x36f   : > { %3577 = vmatpush3.msk.msra.mxu0 %vm4501_vm2, %v2311_v38  ;;  %3538 = vmatprep.subr.msk.mxu1 %vm4501_vm2, %v1794_v13  ;;  %v5446_v13 = vld [vmem:[#allocation11 + $0x48] sm:$0xff] }
 0x370   : > { %3578 = vmatprep.subr.msk.mxu0 %vm4546_vm5, %v2462_v14  ;;  %3539 = vmatpush3.msra.mxu1 %v1646_v60 }
 0x371   : > { %3579 = vmatpush3.msk.msra.mxu0 %vm4501_vm2, %v2310_v22  ;;  %v1585_v39 = vpop.permute.xlu0 %1584  ;;  %3540 = vmatprep.subr.mxu1 %v5696_v59  ;;  %v3970_v41 = vpop.permute.xlu1 %3969 }
 0x372   : > { %3580 = vmatprep.subr.msk.mxu0 %vm4546_vm5, %v2461_v55  ;;  %v3971_v45 = vunpack.i.l.bf16 %v3970_v41  ;;  %3541 = vmatpush3.msk.msra.mxu1 %vm4546_vm5, %v1601_v6  ;;  %v1598_v18 = vsel %vm343_vm10, %v3967_v56, %v1585_v39  ;;  %v3972_v12 = vunpack.i.h.bf16 %v3970_v41 }
 0x373   : > { %3581 = vmatpush3.msk.msra.mxu0 %vm4501_vm2, %v2309_v43  ;;  %3542 = vmatprep.subr.mxu1 %v5701_v62  ;;  %v5709_v62 = vld [vmem:[#allocation21_spill] sm:$0xff] }
 0x374   : > { %3582 = vmatprep.subr.msk.mxu0 %vm4546_vm5, %v2460_v40  ;;  %3543 = vmatpush3.msk.msra.mxu1 %vm4546_vm5, %v1600_v58  ;;  %v2415_v10 = vsel %vm545_vm8, %v2409_v21, %v3971_v45  ;;  %v5442_v21 = vld [vmem:[#allocation11 + $0x50] sm:$0xff] }
 0x375   : > { %3583 = vmatpush3.msk.msra.mxu0 %vm4501_vm2, %v2308_v63  ;;  %v2263_v24 = vpop.permute.xlu0 %2262  ;;  %3544 = vmatprep.subr.mxu1 %v5702_v2  ;;  %v2261_v27 = vpop.permute.xlu1 %2260 }
 0x376   : > { %v2267_v49 = vsel %vm392_vm9, %v2261_v27, %v2263_v24  ;;  %3584 = vmatprep.subr.msk.mxu0 %vm4501_vm2, %v2415_v10  ;;  %3545 = vmatpush3.msk.msra.mxu1 %vm4546_vm5, %v1599_v28 }
 0x377   : > { %3546 = vmatprep.subr.mxu1 %v5703_v34  ;;  %3585 = vmatpush3.msra.mxu0 %v2267_v49 }
 0x378   : > { %3547 = vmatpush3.msk.msra.mxu1 %vm4546_vm5, %v1598_v18  ;;  %3713 = vmatprep.mubr.msk.f32.mxu0 %vm753_vm0, %v5406_v50 }
 0x379   : > { %v2257_v42 = vpop.permute.xlu0 %2256  ;;  %v2405_v52 = vpop.permute.xlu1 %2404  ;;  %2075 = vmatmul.mubr.f32.vlgmr.msra.gmra.mxu1 %v5413_v61  ;;  %3714 = vmatmul.mubr.msk.f32.gmra.mxu0 %vm753_vm0, %v5415_v51 }
 0x37a   : > { %v2414_v54 = vsel %vm545_vm8, %v2405_v52, %v3972_v12  ;;  %2079 = vmatprep.mubr.f32.mxu1 %v5419_v11  ;;  %2692 = vmatprep.mubr.f32.mxu0 %v5704_v44 }
 0x37b   : > { %3586 = vmatprep.subr.msk.mxu0 %vm4501_vm2, %v2414_v54 }
 0x37d   : > { %v2401_v46 = vpop.permute.xlu0 %2400  ;;  %v2259_v19 = vpop.permute.xlu1 %2258  ;;  %2080 = vmatmul.mubr.f32.gmra.mxu1 %v5430_v25 }
 0x37e   : > { %v2266_v16 = vsel %vm392_vm9, %v2257_v42, %v2259_v19  ;;  %2084 = vmatprep.mubr.f32.mxu1 %v5435_v17 }
 0x37f   : > { %3587 = vmatpush3.msra.mxu0 %v2266_v16 }
 0x381   : > { %v2253_v29 = vpop.permute.xlu0 %2252  ;;  %v3975_v30 = vpop.permute.xlu1 %3974  ;;  %2085 = vmatmul.mubr.f32.gmra.mxu1 %v5440_v1 }
 0x382   : > { %v3976_v4 = vunpack.i.l.bf16 %v3975_v30  ;;  %2089 = vmatprep.mubr.f32.mxu1 %v5442_v21  ;;  %v3977_v53 = vunpack.i.h.bf16 %v3975_v30 }
 0x384   : > { %v2413_v8 = vsel %vm545_vm8, %v2401_v46, %v3976_v4 }
 0x385   : > { %v2397_v38 = vpop.permute.xlu0 %2396  ;;  %v2255_v33 = vpop.permute.xlu1 %2254  ;;  %3588 = vmatprep.subr.msk.mxu0 %vm4501_vm2, %v2413_v8  ;;  %2090 = vmatmul.mubr.f32.gmra.mxu1 %v5446_v13 }
 0x386   : > { %v2412_v47 = vsel %vm545_vm8, %v2397_v38, %v3977_v53  ;;  %v2265_v0 = vsel %vm392_vm9, %v2253_v29, %v2255_v33  ;;  %3724 = vmatprep.mubr.msk.f32.mxu1 %vm753_vm0, %v5705_v7 }
 0x387   : > { %3589 = vmatpush3.msra.mxu0 %v2265_v0 }
 0x388   : > { %3590 = vmatprep.subr.msk.mxu0 %vm4501_vm2, %v2412_v47 }
 0x389   : > { %v2251_v36 = vpop.permute.xlu0 %2250  ;;  %v2249_v60 = vpop.permute.xlu1 %2248 }
 0x38a   : > { %v2264_v14 = vsel %vm392_vm9, %v2249_v60, %v2251_v36 }
 0x38b   : > { %3591 = vmatpush3.msra.mxu0 %v2264_v14 }
 0x38c   : > { %3592 = vmatprep.subr.mxu0 %v5706_v9 }
 0x38d   : > { %v2215_v57 = vpop.permute.xlu0 %2214  ;;  %v2213_v22 = vpop.permute.xlu1 %2212 }
 0x38e   : > { %v2219_v35 = vsel %vm343_vm10, %v2213_v22, %v2215_v57 }
 0x38f   : > { %3593 = vmatpush3.msk.msra.mxu0 %vm4546_vm5, %v2219_v35 }
 0x390   : > { %3594 = vmatprep.subr.mxu0 %v5707_v20 }
 0x391   : > { %v3980_v6 = vpop.permute.xlu0 %3979  ;;  %v2549_v37 = vpop.permute.xlu1 %2548 }
 0x392   : > { %v3981_v55 = vunpack.i.l.bf16 %v3980_v6  ;;  %v3982_v3 = vunpack.i.h.bf16 %v3980_v6 }
 0x394   : > { %v2555_v5 = vsel %vm688_vm1, %v2549_v37, %v3981_v55 }
 0x395   : > { %v2211_v39 = vpop.permute.xlu0 %2210  ;;  %3716 = vmatprep.subr.msk.mxu1 %vm4501_vm2, %v2555_v5  ;;  %v2209_v59 = vpop.permute.xlu1 %2208 }
 0x396   : > { %v2218_v41 = vsel %vm343_vm10, %v2209_v59, %v2211_v39  ;;  %3717 = vmatpush3.msk.msra.mxu1 %vm4501_vm2, %v2555_v5 }
 0x397   : > { %3595 = vmatpush3.msk.msra.mxu0 %vm4546_vm5, %v2218_v41 }
 0x398   : > { %3596 = vmatprep.subr.mxu0 %v5708_v23 }
 0x399   : > { %v2205_v43 = vpop.permute.xlu0 %2204  ;;  %v2545_v45 = vpop.permute.xlu1 %2544 }
 0x39a   : > { %v2554_v48 = vsel %vm688_vm1, %v2545_v45, %v3982_v3 }
 0x39b   : > { %3718 = vmatprep.subr.msk.mxu1 %vm4501_vm2, %v2554_v48 }
 0x39c   : > { %3719 = vmatpush3.msk.msra.mxu1 %vm4501_vm2, %v2554_v48 }
 0x39d   : > { %v2541_v58 = vpop.permute.xlu0 %2540  ;;  %v2207_v26 = vpop.permute.xlu1 %2206 }
 0x39e   : > { %v2217_v40 = vsel %vm343_vm10, %v2205_v43, %v2207_v26 }
 0x39f   : > { %3597 = vmatpush3.msk.msra.mxu0 %vm4546_vm5, %v2217_v40 }
 0x3a0   : > { %3598 = vmatprep.subr.mxu0 %v5709_v62 }
 0x3a1   : > { %v2543_v63 = vpop.permute.xlu1 %2542  ;;  %v2201_v56 = vpop.permute.xlu0 %2200 }
 0x3a2   : > { %v2553_v10 = vsel %vm688_vm1, %v2541_v58, %v2543_v63 }
 0x3a3   : > { %3720 = vmatprep.subr.msk.mxu1 %vm4501_vm2, %v2553_v10 }
 0x3a4   : > { %3721 = vmatpush3.msk.msra.mxu1 %vm4501_vm2, %v2553_v10 }
 0x3a5   : > { %v2203_v28 = vpop.permute.xlu1 %2202  ;;  %v2537_v2 = vpop.permute.xlu0 %2536 }
 0x3a6   : > { %v2216_v24 = vsel %vm343_vm10, %v2201_v56, %v2203_v28  ;;  %v2899_v56 = vld [vmem:[%s5624_s3] sm:$0xf] }
 0x3a7   : > { %3599 = vmatpush3.msk.msra.mxu0 %vm4546_vm5, %v2216_v24  ;;  %v2974_v28 = vld [vmem:[%s5625_s4] sm:$0xff] }
 0x3a8   : > { %2693 = vmatmul.mubr.f32.vlgmr.msra.gmra.mxu0 %v5413_v61  ;;  %3620 = vmatprep.subr.mxu0 %v4175_v15 }
 0x3a9   : > { %v2539_v27 = vpop.permute.xlu1 %2538  ;;  %2697 = vmatprep.mubr.f32.mxu0 %v5419_v11  ;;  %3621 = vmatpush3.msra.mxu0 %v4175_v15 }
 0x3aa   : > { %v2552_v49 = vsel %vm688_vm1, %v2537_v2, %v2539_v27  ;;  %3622 = vmatprep.subr.mxu0 %v4175_v15 }
 0x3ab   : > { %3722 = vmatprep.subr.msk.mxu1 %vm4501_vm2, %v2552_v49  ;;  %3623 = vmatpush3.msra.mxu0 %v4175_v15 }
 0x3ac   : > { %2698 = vmatmul.mubr.f32.gmra.mxu0 %v5430_v25  ;;  %3723 = vmatpush3.msk.msra.mxu1 %vm4501_vm2, %v2552_v49  ;;  %v2975_v49 = vld [vmem:[%s5625_s4 + $0x8] sm:$0xff] }
 0x3ad   : > { %3725 = vmatmul.mubr.msk.f32.vlgmr.msra.gmra.mxu1 %vm753_vm0, %v5262_v32  ;;  %2702 = vmatprep.mubr.f32.mxu0 %v5435_v17 }
 0x3ae   : > { %3727 = vmatprep.mubr.msk.f32.mxu1 %vm753_vm0, %v5406_v50  ;;  %3730 = vmatprep.subr.mxu1 %v5710_v31 }
 0x3af   : > { %3624 = vmatprep.subr.mxu0 %v4175_v15 }
 0x3b0   : > { %2703 = vmatmul.mubr.f32.gmra.mxu0 %v5440_v1 }
 0x3b1   : > { %2707 = vmatprep.mubr.f32.mxu0 %v5442_v21  ;;  %3728 = vmatmul.mubr.msk.f32.gmra.mxu1 %vm753_vm0, %v5415_v51 }
 0x3b2   : > { %3625 = vmatpush3.msra.mxu0 %v4175_v15  ;;  %3738 = vmatprep.mubr.msk.f32.mxu1 %vm4176_vm11, %v5710_v31 }
 0x3b3   : > { %3626 = vmatprep.subr.mxu0 %v4175_v15 }
 0x3b4   : > { %2708 = vmatmul.mubr.f32.gmra.mxu0 %v5446_v13 }
 0x3b5   : > { %3627 = vmatpush3.msra.mxu0 %v4175_v15 }
 0x3b6   : > { %3628 = vmatprep.subr.mxu0 %v4175_v15 }
 0x3b7   : > { %3629 = vmatpush3.msra.mxu0 %v4175_v15 }
 0x3b8   : > { %3630 = vmatprep.subr.mxu0 %v4175_v15 }
 0x3b9   : > { %3631 = vmatpush3.msra.mxu0 %v4175_v15 }
 0x3ba   : > { %3632 = vmatprep.subr.mxu0 %v4175_v15 }
 0x3bb   : > { %3633 = vmatpush3.msra.mxu0 %v4175_v15 }
 0x3bc   : > { %3634 = vmatprep.subr.mxu0 %v4175_v15 }
 0x3bd   : > { %3635 = vmatpush3.msra.mxu0 %v4175_v15 }
 0x3be   : > { %3636 = vmatprep.subr.mxu0 %v4175_v15 }
 0x3bf   : > { %3637 = vmatpush3.msra.mxu0 %v4175_v15 }
 0x3c0   : > { %3638 = vmatprep.subr.mxu0 %v4175_v15 }
 0x3c1   : > { %3639 = vmatpush3.msra.mxu0 %v4175_v15 }
 0x3c2   : > { %3640 = vmatprep.subr.mxu0 %v4175_v15 }
 0x3c3   : > { %3641 = vmatpush3.msra.mxu0 %v4175_v15 }
 0x3c4   : > { %3642 = vmatprep.subr.mxu0 %v4175_v15 }
 0x3c5   : > { %3643 = vmatpush3.msra.mxu0 %v4175_v15 }
 0x3c6   : > { %3644 = vmatprep.subr.mxu0 %v4175_v15 }
 0x3c7   : > { %3645 = vmatpush3.msra.mxu0 %v4175_v15 }
 0x3c8   : > { %3646 = vmatprep.subr.mxu0 %v4175_v15 }
 0x3c9   : > { %3647 = vmatpush3.msra.mxu0 %v4175_v15 }
 0x3ca   : > { %3648 = vmatprep.subr.mxu0 %v4175_v15 }
 0x3cb   : > { %3649 = vmatpush3.msra.mxu0 %v4175_v15 }
 0x3cc   : > { %3650 = vmatprep.subr.mxu0 %v4175_v15 }
 0x3cd   : > { %3651 = vmatpush3.msra.mxu0 %v4175_v15  ;;  %v2977_v15 = vld [vmem:[%s5625_s4 + $0x18] sm:$0xff] }
 0x426   : > { %v3712_v51 = vpop.f32.mrf.mxu0 }
 0x428   : > { %v2161_v34 = vpop.f32.mrf.mxu0 }
 0x439   : > { %v3548_v32 = vpop.f32.mrf.mxu1  ;;  %v3715_v12 = vpop.f32.mrf.mxu0 }
 0x43b   : > { %v3549_v50 = vpop.f32.mrf.mxu1  ;;  %v2171_v52 = vpop.f32.mrf.mxu0 }
 0x43c   : > { %v3550_v19 = vadd.f32 %v3549_v50, %v3548_v32  ;;  %v4177_v32 = vmov 0  }
 0x43d   : > { %v3551_v61 = vpop.f32.mrf.mxu1  ;;  %3983 = vset.pattern.permute.xlu1 %v4177_v32  ;;  %3984 = vset.pattern.permute.xlu0 %v4177_v32 }
 0x43e   : > { %v5511_v8 = vadd.f32 %v3550_v19, %v2161_v34 }
 0x43f   : > { %v3552_v18 = vpop.f32.mrf.mxu1 }
 0x440   : > { %v3553_v53 = vadd.f32 %v3552_v18, %v3551_v61 }
 0x441   : > { %v3554_v11 = vpop.f32.mrf.mxu1 }
 0x442   : > { %v5518_v60 = vadd.f32 %v3712_v51, %v3553_v53 }
 0x443   : > { %v3555_v42 = vpop.f32.mrf.mxu1 }
 0x444   : > { %v3556_v14 = vadd.f32 %v3555_v42, %v3554_v11 }
 0x445   : > { %v3557_v54 = vpop.f32.mrf.mxu1 }
 0x446   : > { %v5524_v20 = vadd.f32 %v3556_v14, %v2171_v52 }
 0x447   : > { %v3558_v17 = vpop.f32.mrf.mxu1 }
 0x448   : > { %v3559_v35 = vadd.f32 %v3558_v17, %v3557_v54 }
 0x44a   : > { %v5530_v37 = vadd.f32 %v3715_v12, %v3559_v35 }
 0x468   : > { %v3600_v25 = vpop.f32.mrf.mxu0 }
 0x46a   : > { %v3601_v44 = vpop.f32.mrf.mxu0 }
 0x46b   : > { %v3602_v1 = vadd.f32 %v3601_v44, %v3600_v25 }
 0x46c   : > { %v3603_v46 = vpop.f32.mrf.mxu0 }
 0x46d   : > { %v3726_v16 = vpop.f32.mrf.mxu1 }
 0x46e   : > { %v3604_v21 = vpop.f32.mrf.mxu0 }
 0x46f   : > { %v3605_v29 = vadd.f32 %v3604_v21, %v3603_v46  ;;  %v2779_v30 = vpop.f32.mrf.mxu1 }
 0x470   : > { %v5509_v4 = vadd.f32 %v3602_v1, %v2779_v30  ;;  %v3606_v13 = vpop.f32.mrf.mxu0 }
 0x471   : > { %v5513_v38 = vadd.f32 %v3726_v16, %v3605_v29  ;;  %v3729_v33 = vpop.f32.mrf.mxu1 }
 0x472   : > { %v3607_v47 = vpop.f32.mrf.mxu0  ;;  %2874 = vmatprep.mubr.f32.mxu0 %v5509_v4 }
 0x473   : > { %v3608_v0 = vadd.f32 %v3607_v47, %v3606_v13  ;;  %2875 = vmatmul.mubr.f32.vlgmr.msra.gmra.mxu0 %v5511_v8  ;;  %v2789_v7 = vpop.f32.mrf.mxu1 }
 0x474   : > { %v3609_v36 = vpop.f32.mrf.mxu0  ;;  %2879 = vmatprep.mubr.f32.mxu0 %v5513_v38 }
 0x475   : > { %v5520_v9 = vadd.f32 %v3608_v0, %v2789_v7 }
 0x476   : > { %v3610_v57 = vpop.f32.mrf.mxu0 }
 0x477   : > { %v3611_v22 = vadd.f32 %v3610_v57, %v3609_v36  ;;  %2880 = vmatmul.mubr.f32.gmra.mxu0 %v5518_v60 }
 0x478   : > { %2884 = vmatprep.mubr.f32.mxu0 %v5520_v9 }
 0x479   : > { %v5526_v6 = vadd.f32 %v3729_v33, %v3611_v22 }
 0x47b   : > { %2885 = vmatmul.mubr.f32.gmra.mxu0 %v5524_v20 }
 0x47c   : > { %2889 = vmatprep.mubr.f32.mxu0 %v5526_v6 }
 0x47f   : > { %2890 = vmatmul.mubr.f32.gmra.mxu0 %v5530_v37 }
 0x533   : > { %v3652_v55 = vpop.f32.mrf.mxu0 }
 0x535   : > { %v3653_v5 = vpop.f32.mrf.mxu0 }
 0x536   : > { %v3654_v40 = vadd.f32 %v3653_v5, %v3652_v55  ;;  %v4001_v5 = vld [vmem:[%s4343_s30 + $0x10] sm:$0xff] }
 0x537   : > { %v3655_v39 = vpop.f32.mrf.mxu0 }
 0x538   : > { %v2895_v10 = vmul.f32 0.00390625, %v3654_v40 }
 0x539   : > { %v3656_v59 = vpop.f32.mrf.mxu0 }
 0x53a   : > { %v3657_v58 = vadd.f32 %v3656_v59, %v3655_v39  ;;  %v4002_v59 = vld [vmem:[%s4343_s30 + $0x18] sm:$0xff] }
 0x53b   : > { %v3658_v41 = vpop.f32.mrf.mxu0 }
 0x53c   : > { %v2896_v63 = vmul.f32 0.00390625, %v3657_v58 }
 0x53d   : > { %v3659_v3 = vpop.f32.mrf.mxu0 }
 0x53e   : > { %v3660_v45 = vadd.f32 %v3659_v3, %v3658_v41 }
 0x53f   : > { %v3661_v23 = vpop.f32.mrf.mxu0 }
 0x540   : > { %v2897_v62 = vmul.f32 0.00390625, %v3660_v45 }
 0x541   : > { %v3662_v43 = vpop.f32.mrf.mxu0 }
 0x542   : > { %v3663_v48 = vadd.f32 %v3662_v43, %v3661_v23  ;;  %v4003_v43 = vld [vmem:[%s4343_s30] sm:$0xff] }
 0x544   : > { %v2898_v26 = vmul.f32 0.00390625, %v3663_v48 }
 0x546   : > { %3731 = vmatpush3.msra.mxu1 %v2898_v26 }
 0x547   : > { %3732 = vmatprep.subr.mxu1 %v5710_v31 }
 0x548   : > { %3733 = vmatpush3.msra.mxu1 %v2897_v62  ;;  %v4005_v62 = vld [vmem:[%s4343_s30 + $0x30] sm:$0xff] }
 0x549   : > { %3734 = vmatprep.subr.mxu1 %v5710_v31 }
 0x54a   : > { %3735 = vmatpush3.msra.mxu1 %v2896_v63 }
 0x54b   : > { %3736 = vmatprep.subr.mxu1 %v5710_v31  ;;  %v2976_v31 = vld [vmem:[%s5625_s4 + $0x10] sm:$0xff] }
 0x54c   : > { %3737 = vmatpush3.msra.mxu1 %v2895_v10  ;;  %v4006_v10 = vld [vmem:[%s4343_s30 + $0x38] sm:$0xff] }
 0x54d   : > { %3739 = vmatmul.mubr.msk.f32.vlgmr.msra.gmra.mxu1 %vm753_vm0, %v2899_v56 }
 0x54e   : > { %3743 = vmatprep.mubr.msk.f32.mxu1 %vm2978_vm12, %v2974_v28  ;;  %v4007_v28 = vld [vmem:[%s4343_s30 + $0x20] sm:$0xff] }
 0x60d   : > { %v2969_v24 = vpop.f32.mrf.mxu1 }
 0x60e   : > { %v2973_v2 = vmax.f32 %v2969_v24, 0.0 }
 0x60f   : > { %v3740_v27 = vpop.f32.mrf.mxu1 }
 0x610   : > { %3741 = vmatprep.subr.msk.mxu1 %vm2991_vm13, %v2973_v2 }
 0x611   : > { %3742 = vmatpush3.msk.msra.mxu1 %vm2991_vm13, %v2973_v2 }
 0x612   : > { %3744 = vmatmul.mubr.msk.f32.vlgmr.msra.gmra.mxu1 %vm2978_vm12, %v2975_v49 }
 0x613   : > { %3746 = vmatprep.mubr.msk.f32.mxu1 %vm2978_vm12, %v2976_v31 }
 0x616   : > { %3747 = vmatmul.mubr.msk.f32.gmra.mxu1 %vm2978_vm12, %v2977_v15 }
 0x6d2   : > { %v3745_v50 = vpop.f32.mrf.mxu1 }
 0x6d3   : > { %v3306_v61 = vclamps-f32 %v3745_v50, 30.0 }
 0x6d4   : > { %v3061_v51 = vpop.f32.mrf.mxu1 }
 0x6d5   : > { %v3089_v18 = vsub.f32 0.0, %v3306_v61  ;;  %v3305_v34 = vclamps-f32 %v3061_v51, 30.0 }
 0x6d6   : > { %v3748_v11 = vpop.f32.mrf.mxu1 }
 0x6d7   : > { %v3094_v12 = vmul.f32 1.442695, %v3089_v18  ;;  %v3088_v42 = vsub.f32 0.0, %v3305_v34  ;;  %v3308_v52 = vclamps-f32 %v3748_v11, 30.0 }
 0x6d8   : > { %v3071_v54 = vpop.f32.mrf.mxu1 }
 0x6d9   : > { %3985 = vpow2.f32 %v3094_v12  ;;  %v3092_v25 = vmul.f32 1.442695, %v3088_v42  ;;  %v3091_v44 = vsub.f32 0.0, %v3308_v52  ;;  %v3307_v17 = vclamps-f32 %v3071_v54, 30.0 }
 0x6db   : > { %3987 = vpow2.f32 %v3092_v25  ;;  %v3098_v46 = vmul.f32 1.442695, %v3091_v44  ;;  %v3090_v19 = vsub.f32 0.0, %v3307_v17 }
 0x6dd   : > { %3989 = vpow2.f32 %v3098_v46  ;;  %v3096_v16 = vmul.f32 1.442695, %v3090_v19 }
 0x6df   : > { %3991 = vpow2.f32 %v3096_v16 }
 0x6e6   : > { %v3986_v1 = vpop.eup %3985 }
 0x6e7   : > { %v3101_v21 = vadd.f32 1.0, %v3986_v1 }
 0x6e8   : > { %v3988_v29 = vpop.eup %3987 }
 0x6e9   : > { %3993 = vrcp.f32 %v3101_v21  ;;  %v3100_v30 = vadd.f32 1.0, %v3988_v29 }
 0x6ea   : > { %v3990_v13 = vpop.eup %3989 }
 0x6eb   : > { %3995 = vrcp.f32 %v3100_v30  ;;  %v3103_v53 = vadd.f32 1.0, %v3990_v13 }
 0x6ec   : > { %v3992_v33 = vpop.eup %3991 }
 0x6ed   : > { %v3102_v47 = vadd.f32 1.0, %v3992_v33  ;;  %3997 = vrcp.f32 %v3103_v53 }
 0x6ef   : > { %3999 = vrcp.f32 %v3102_v47 }
 0x6f6   : > { %v3994_v0 = vpop.eup %3993 }
 0x6f7   : > { %3127 = vperm.xlu1 %3983, %v3994_v0  }
 0x6f8   : > { %v3996_v7 = vpop.eup %3995 }
 0x6f9   : > { %3122 = vperm.xlu0 %3984, %v3996_v7  }
 0x6fa   : > { %v3998_v36 = vpop.eup %3997 }
 0x6fc   : > { %v4000_v14 = vpop.eup %3999 }
 0x6fd   : > { %3137 = vperm.xlu0 %3984, %v3998_v36   ;;  %3132 = vperm.xlu1 %3983, %v4000_v14  }
 0x772   : > { %v3128_v57 = vpop.permute.xlu1 %3127 }
 0x773   : > { %v3142_v22 = vmul.f32 %v3128_v57, %v5518_v60  ;;  %v3143_v35 = vmul.f32 %v3128_v57, %v5513_v38  ;;  %v4004_v60 = vld [vmem:[%s4343_s30 + $0x8] sm:$0xff] }
 0x774   : > { %v3123_v55 = vpop.permute.xlu0 %3122 }
 0x775   : > { %v3150_v39 = vadd.f32 %v4001_v5, %v3142_v22  ;;  %v3151_v41 = vadd.f32 %v4002_v59, %v3143_v35  ;;  %v3140_v3 = vmul.f32 %v3123_v55, %v5511_v8  ;;  %v3141_v23 = vmul.f32 %v3123_v55, %v5509_v4 }
 0x777   : > { %3158 = vst [vmem:[%s271_s12 + $0x10] sm:$0xff] %v3150_v39  ;;  %3159 = vst [vmem:[%s271_s12 + $0x18] sm:$0xff] %v3151_v41  ;;  %v3148_v45 = vadd.f32 %v4003_v43, %v3140_v3  ;;  %v3149_v48 = vadd.f32 %v4004_v60, %v3141_v23 }
 0x778   : > { %v3138_v38 = vpop.permute.xlu0 %3137  ;;  %v3133_v58 = vpop.permute.xlu1 %3132 }
 0x779   : > { %3156 = vst [vmem:[%s271_s12] sm:$0xff] %v3148_v45  ;;  %3157 = vst [vmem:[%s271_s12 + $0x8] sm:$0xff] %v3149_v48  ;;  %v3146_v4 = vmul.f32 %v3138_v38, %v5530_v37  ;;  %v3147_v8 = vmul.f32 %v3138_v38, %v5526_v6  ;;  %v3144_v26 = vmul.f32 %v3133_v58, %v5524_v20  ;;  %v4008_v37 = vld [vmem:[%s4343_s30 + $0x28] sm:$0xff]  ;;  %s4095_s30 = scalar_lea.vmem %s4094_s24, 2048 }
 0x77a   : > { %v3145_v40 = vmul.f32 %v3133_v58, %v5520_v9  ;;  %p4097_p12 = scmp.lt.s32.totalorder %s4095_s30, %s4089_s14 }
 0x77b   : > { %v3154_v63 = vadd.f32 %v4005_v62, %v3146_v4  ;;  %v3155_v56 = vadd.f32 %v4006_v10, %v3147_v8  ;;  %v3152_v24 = vadd.f32 %v4007_v28, %v3144_v26 }
 0x77c   : > { %v3153_v2 = vadd.f32 %v4008_v37, %v3145_v40  ;;  %p4098_p7 = por %p4097_p12, %p4096_p6 }
 0x77d   : > { %3162 = vst [vmem:[%s271_s12 + $0x30] sm:$0xff] %v3154_v63  ;;  %3163 = vst [vmem:[%s271_s12 + $0x38] sm:$0xff] %v3155_v56 }
 0x77e   : > { %3160 = vst [vmem:[%s271_s12 + $0x20] sm:$0xff] %v3152_v24  ;;  %3161 = vst [vmem:[%s271_s12 + $0x28] sm:$0xff] %v3153_v2  ;;  %p4099_p9 = pnand %p4098_p7, %p4092_p2 }
 0x780   : > { %4102 = shalt.err (!%p4099_p9)
}
 0x781   : > { %s4103_s26 = scalar_lea.hbm %s5571_s13, 1024  ;;  %s4107_s11 = scalar_lea.hbm %s5626_s5, 2048 }
 0x782   : > { %p4104_p13 = scmp.ne.s32.totalorder %s5571_s13, %s4103_s26  ;;  %p4108_p4 = scmp.lt.s32.totalorder %s5571_s13, %s5626_s5 }
 0x783   : > { %p4109_p8 = scmp.lt.s32.totalorder %s4107_s11, %s4103_s26 }
 0x784   : > { %p4105_p5 = pnand %p4104_p13, %p5711_p10 }
 0x785   : > { %p4110_p3 = por %p4109_p8, %p4108_p4 }
 0x786   : > { %p4106_p0 = pneg %p4105_p5 }
 0x788   : > { %p4111_p11 = pnand %p4110_p3, %p4106_p0 }
 0x78a   : > { %4114 = shalt.err (!%p4111_p11)
}
 0x78b   : > { %s4179_s17 = smov 256  }
 0x78c   : > { %3759 = dma.vmem_to_hbm [thread:$0]  (%p5711_p10), %s5577_s7, 1024, %s5571_s13, %s3165_s22, %s4179_s17, %s4179_s17, %s4173_s28  }
 0x78d PF: > { %s3193_s9 = sand.u32 1, %s4145_s18   ;;  %p5712_p1 = scmp.ne.s32.totalorder %s5647_s25, 0 }
 0x78e   : > { %p5713_p2 = scmp.ge.s32.totalorder %s4157_s21, 2  ;;  %s3194_s14 = scalar_lea.sflag [#allocation8], %s3193_s9 }
 0x790   : > { %p3773_p6 = pnand %p5713_p2, %p5712_p1 }
 0x792   : > { %p3774_p12 = pneg %p3773_p6 }
 0x794   : > { %4140 = dma.done.wait (%p3774_p12), %s3194_s14, 1024  }
 0x795   : > { %4142 = vsyncadd (%p3774_p12), %s3194_s14, 4294966272  ;;  %p19_p7 = scmp.ge.s32.totalorder %s4282_s15, 4   ;;  %s5714_s18 = smov %s4149_s19 }
 0x796   : > { %s5715_s19 = smov %s4153_s20  ;;  %s5716_s20 = smov %s4298_s27 }
 0x797   : > { %s5717_s21 = smov %s4282_s15  ;;  %21 = sbr.rel (!%p19_p7) target bundleno = 6 (0x6), region = 93 }
 0x79c   :  { %3199 = vsyncpa [#allocation7], 1 }
 0x79d   :  { %3201 = vsyncpa [#allocation7 + $0x1], 1 }
 0x79e   :  { %3202 = vsyncpa [#allocation10], 1 }
 0x79f   :  { %3203 = vsyncpa [#allocation8], 1 }
 0x7a0   :  { %3205 = vsyncpa [#allocation8 + $0x1], 1 }

</bundles_post_ra>
